<compile_context>
chip_gen: v6e
topology: v6e:2x2x1
jax: 0.10.0
libtpu: 0.0.40
codegen_flags: <defaults>
</compile_context>

<pallas_src>
import jax
import jax.numpy as jnp
from jax.experimental import pallas as pl
from jax.experimental.pallas import tpu as pltpu


def _kagrnn_kernel(x_ref, a_ref, wx_ref, wh_ref, wch_ref, bg_ref,
                   wfc_ref, bfc_ref, logp_ref):
    """Whole-sequence recurrence in one invocation (no grid).

    x_ref   : (S*B*N, D)   time-major, row-flattened inputs
    a_ref   : (B*N, B*N)   block-diagonal adaptive adjacency kron(I_B, A)
    wx_ref  : (D, 3H)      fused [Wzx | Wrx | Wcx]
    wh_ref  : (H, 2H)      fused [Wzh | Wrh]
    wch_ref : (H, H)
    bg_ref  : (1, 3H)      fused [bz | br | bc]
    wfc_ref : (H, OUT), bfc_ref : (1, OUT)
    logp_ref: (B*N, OUT)   log-softmax output
    """
    BN = a_ref.shape[0]
    S = x_ref.shape[0] // BN
    H = wh_ref.shape[0]

    a = a_ref[...]
    wh = wh_ref[...]
    wch = wch_ref[...]
    # Hoisted bias broadcast: built once, reused by every unrolled step.
    bg = jnp.broadcast_to(bg_ref[...], (BN, 3 * H))

    # x-side gate projection for ALL timesteps in one matmul (hoisted out of the
    # recurrence via associativity: A @ (x_t @ Wx) == (A @ x_t) @ Wx).
    xw = jnp.dot(x_ref[...], wx_ref[...],
                 preferred_element_type=jnp.float32)                    # (S*BN, 3H)

    h = jnp.zeros((BN, H), dtype=jnp.float32)
    # Fully unrolled time loop (S small & static): equivalent to
    # lax.fori_loop(0, S, ..., unroll=True) but keeps every slice offset static.
    for t in range(S):
        gx = jnp.dot(a, xw[t * BN:(t + 1) * BN, :],
                     preferred_element_type=jnp.float32) + bg           # (BN, 3H)
        ah = jnp.dot(a, h, preferred_element_type=jnp.float32)          # (BN, H)
        gh = jnp.dot(ah, wh, preferred_element_type=jnp.float32)        # (BN, 2H)
        z = jax.nn.sigmoid(gx[:, :H] + gh[:, :H])
        r = jax.nn.sigmoid(gx[:, H:2 * H] + gh[:, H:])
        arh = jnp.dot(a, r * h, preferred_element_type=jnp.float32)     # (BN, H)
        h_hat = jnp.tanh(gx[:, 2 * H:]
                         + jnp.dot(arh, wch, preferred_element_type=jnp.float32))
        h = z * h + (1.0 - z) * h_hat

    # fc = Linear(H, OUT) + ReLU(inplace), then log_softmax over the class axis.
    o = jnp.maximum(jnp.dot(h, wfc_ref[...], preferred_element_type=jnp.float32)
                    + bfc_ref[...], 0.0)
    m = jnp.max(o, axis=-1, keepdims=True)
    lse = jnp.log(jnp.sum(jnp.exp(o - m), axis=-1, keepdims=True)) + m
    logp_ref[...] = o - lse


_PARAM_ORDER = ('emb', 'wzx', 'wzh', 'bz', 'wrx', 'wrh', 'br',
                'wcx', 'wch', 'bc', 'wfc', 'bfc')


def kagrnn_forward(x, params):
    """x: (seq, batch, num_node, input_dim) f32 -> (batch*num_node, output_dim) log-probs."""
    S, B, N, D = x.shape
    H = params['wzh'].shape[0]
    OUT = params['wfc'].shape[1]

    # Adaptive adjacency A = softmax(relu(E E^T), -1): sequence-invariant, so it is
    # computed once here (tiny N x N) instead of inside the recurrence.  The batch
    # dimension is folded into a block-diagonal kron(I_B, A) so graph propagation
    # inside the kernel is one 2-D matmul on the row-flattened (B*N, F) state.
    e = params['emb'].astype(jnp.float32)
    a = jax.nn.softmax(jnp.maximum(jnp.dot(e, e.T), 0.0), axis=-1)       # (N, N)
    a_big = jnp.kron(jnp.eye(B, dtype=jnp.float32), a)                   # (B*N, B*N)

    # Fuse gate weights / biases once (outside the kernel, not per timestep).
    wx = jnp.concatenate([params['wzx'], params['wrx'], params['wcx']], axis=1)  # (D, 3H)
    wh = jnp.concatenate([params['wzh'], params['wrh']], axis=1)                 # (H, 2H)
    bg = jnp.concatenate([params['bz'], params['br'], params['bc']], axis=1)     # (1, 3H)

    x2d = x.reshape(S * B * N, D).astype(jnp.float32)   # rows ordered (t, b, n)

    vmem = pl.BlockSpec(memory_space=pltpu.MemorySpace.VMEM)
    logp = pl.pallas_call(
        _kagrnn_kernel,
        out_shape=jax.ShapeDtypeStruct((B * N, OUT), jnp.float32),
        in_specs=[vmem] * 8,
        out_specs=vmem,
    )(x2d, a_big, wx, wh, params['wch'], bg, params['wfc'], params['bfc'])

    # output[:, -1:, :, :] -> fc -> .view(-1, 2) -> log_softmax(dim=1);
    # rows are already (batch-major, node-minor), matching the PyTorch .view(-1, 2).
    return logp


def init_params(key, D, H, OUT, N, EMB=8):
    ks = jax.random.split(key, len(_PARAM_ORDER))
    def w(k, shape, scale=0.1):
        return (scale * jax.random.normal(k, shape)).astype(jnp.float32)
    shapes = {
        'emb': (N, EMB),
        'wzx': (D, H), 'wzh': (H, H), 'bz': (1, H),
        'wrx': (D, H), 'wrh': (H, H), 'br': (1, H),
        'wcx': (D, H), 'wch': (H, H), 'bc': (1, H),
        'wfc': (H, OUT), 'bfc': (1, OUT),
    }
    scales = {'emb': 0.5}
    return {name: w(k, shapes[name], scales.get(name, 0.1))
            for name, k in zip(_PARAM_ORDER, ks)}


if __name__ == "__main__":
    # small shapes implied by the forward: x = [seq, batch, num_node, input_dim]
    SEQ, B, N, D, H, OUT = 8, 2, 8, 2, 32, 2
    HEAD, NUM_CLUSTERS, TOP_K, NUM_LAYERS = 2, 4, 2, 1  # accepted, see TODO(synk)

    key = jax.random.PRNGKey(0)
    kx, kp = jax.random.split(key)
    x = jax.random.normal(kx, (SEQ, B, N, D), dtype=jnp.float32)
    params = init_params(kp, D, H, OUT, N)

    out = jax.jit(kagrnn_forward)(x, params)
    out = jax.block_until_ready(out)

    assert out.shape == (B * N, OUT), out.shape
    assert bool(jnp.all(jnp.isfinite(out)))
    # exp(log_softmax) rows sum to 1
    assert bool(jnp.allclose(jnp.sum(jnp.exp(out), axis=1), 1.0, atol=1e-5))
    print("KERNEL_OK")
</pallas_src>

<mosaic_0001>
module attributes {stable_mosaic.version = 11 : i64} {
  func.func @_kagrnn_kernel(%arg0: memref<128x2xf32, #tpu.memory_space<vmem>>, %arg1: memref<16x16xf32, #tpu.memory_space<vmem>>, %arg2: memref<2x96xf32, #tpu.memory_space<vmem>>, %arg3: memref<32x64xf32, #tpu.memory_space<vmem>>, %arg4: memref<32x32xf32, #tpu.memory_space<vmem>>, %arg5: memref<1x96xf32, #tpu.memory_space<vmem>>, %arg6: memref<32x2xf32, #tpu.memory_space<vmem>>, %arg7: memref<1x2xf32, #tpu.memory_space<vmem>>, %arg8: memref<16x2xf32, #tpu.memory_space<vmem>>) attributes {dimension_semantics = [], scalar_prefetch = 0 : i64, scratch_operands = 0 : i64, tpu.core_type = #tpu.core_type<tc>} {
    %c0 = arith.constant 0 : index
    %c0_0 = arith.constant 0 : index
    %0 = vector.load %arg1[%c0, %c0_0] : memref<16x16xf32, #tpu.memory_space<vmem>>, vector<16x16xf32>
    %c0_1 = arith.constant 0 : index
    %c0_2 = arith.constant 0 : index
    %1 = vector.load %arg3[%c0_1, %c0_2] : memref<32x64xf32, #tpu.memory_space<vmem>>, vector<32x64xf32>
    %c0_3 = arith.constant 0 : index
    %c0_4 = arith.constant 0 : index
    %2 = vector.load %arg4[%c0_3, %c0_4] : memref<32x32xf32, #tpu.memory_space<vmem>>, vector<32x32xf32>
    %c0_5 = arith.constant 0 : index
    %c0_6 = arith.constant 0 : index
    %3 = vector.load %arg5[%c0_5, %c0_6] : memref<1x96xf32, #tpu.memory_space<vmem>>, vector<1x96xf32>
    %4 = vector.shape_cast %3 : vector<1x96xf32> to vector<1x96xf32>
    %5 = vector.broadcast %4 : vector<1x96xf32> to vector<16x96xf32>
    %c0_7 = arith.constant 0 : index
    %c0_8 = arith.constant 0 : index
    %6 = vector.load %arg0[%c0_7, %c0_8] : memref<128x2xf32, #tpu.memory_space<vmem>>, vector<128x2xf32>
    %c0_9 = arith.constant 0 : index
    %c0_10 = arith.constant 0 : index
    %7 = vector.load %arg2[%c0_9, %c0_10] : memref<2x96xf32, #tpu.memory_space<vmem>>, vector<2x96xf32>
    %cst = arith.constant dense<0.000000e+00> : vector<128x96xf32>
    %8 = tpu.matmul %6, %7, %cst {dimension_numbers = #tpu.dot_dimension_numbers<[1], [0], [0], [1], [0, 0, 1, 1], [], []>} : vector<128x2xf32>, vector<2x96xf32>, vector<128x96xf32> -> vector<128x96xf32>
    %cst_11 = arith.constant 0.000000e+00 : f32
    %9 = vector.broadcast %cst_11 : f32 to vector<16x32xf32>
    %10 = vector.extract_strided_slice %8 {offsets = [0, 0], sizes = [16, 96], strides = [1, 1]} : vector<128x96xf32> to vector<16x96xf32>
    %cst_12 = arith.constant dense<0.000000e+00> : vector<16x96xf32>
    %11 = tpu.matmul %0, %10, %cst_12 {dimension_numbers = #tpu.dot_dimension_numbers<[1], [0], [0], [1], [0, 0, 1, 1], [], []>} : vector<16x16xf32>, vector<16x96xf32>, vector<16x96xf32> -> vector<16x96xf32>
    %12 = arith.addf %11, %5 : vector<16x96xf32>
    %cst_13 = arith.constant dense<0.000000e+00> : vector<16x32xf32>
    %13 = tpu.matmul %0, %9, %cst_13 {dimension_numbers = #tpu.dot_dimension_numbers<[1], [0], [0], [1], [0, 0, 1, 1], [], []>} : vector<16x16xf32>, vector<16x32xf32>, vector<16x32xf32> -> vector<16x32xf32>
    %cst_14 = arith.constant dense<0.000000e+00> : vector<16x64xf32>
    %14 = tpu.matmul %13, %1, %cst_14 {dimension_numbers = #tpu.dot_dimension_numbers<[1], [0], [0], [1], [0, 0, 1, 1], [], []>} : vector<16x32xf32>, vector<32x64xf32>, vector<16x64xf32> -> vector<16x64xf32>
    %15 = vector.extract_strided_slice %12 {offsets = [0, 0], sizes = [16, 32], strides = [1, 1]} : vector<16x96xf32> to vector<16x32xf32>
    %16 = vector.extract_strided_slice %14 {offsets = [0, 0], sizes = [16, 32], strides = [1, 1]} : vector<16x64xf32> to vector<16x32xf32>
    %17 = arith.addf %15, %16 : vector<16x32xf32>
    %18 = arith.negf %17 : vector<16x32xf32>
    %19 = math.exp %18 : vector<16x32xf32>
    %cst_15 = arith.constant 1.000000e+00 : f32
    %20 = vector.broadcast %cst_15 : f32 to vector<16x32xf32>
    %21 = arith.addf %20, %19 : vector<16x32xf32>
    %22 = arith.divf %20, %21 : vector<16x32xf32>
    %23 = vector.extract_strided_slice %12 {offsets = [0, 32], sizes = [16, 32], strides = [1, 1]} : vector<16x96xf32> to vector<16x32xf32>
    %24 = vector.extract_strided_slice %14 {offsets = [0, 32], sizes = [16, 32], strides = [1, 1]} : vector<16x64xf32> to vector<16x32xf32>
    %25 = arith.addf %23, %24 : vector<16x32xf32>
    %26 = arith.negf %25 : vector<16x32xf32>
    %27 = math.exp %26 : vector<16x32xf32>
    %cst_16 = arith.constant 1.000000e+00 : f32
    %28 = vector.broadcast %cst_16 : f32 to vector<16x32xf32>
    %29 = arith.addf %28, %27 : vector<16x32xf32>
    %30 = arith.divf %28, %29 : vector<16x32xf32>
    %31 = arith.mulf %30, %9 : vector<16x32xf32>
    %cst_17 = arith.constant dense<0.000000e+00> : vector<16x32xf32>
    %32 = tpu.matmul %0, %31, %cst_17 {dimension_numbers = #tpu.dot_dimension_numbers<[1], [0], [0], [1], [0, 0, 1, 1], [], []>} : vector<16x16xf32>, vector<16x32xf32>, vector<16x32xf32> -> vector<16x32xf32>
    %33 = vector.extract_strided_slice %12 {offsets = [0, 64], sizes = [16, 32], strides = [1, 1]} : vector<16x96xf32> to vector<16x32xf32>
    %cst_18 = arith.constant dense<0.000000e+00> : vector<16x32xf32>
    %34 = tpu.matmul %32, %2, %cst_18 {dimension_numbers = #tpu.dot_dimension_numbers<[1], [0], [0], [1], [0, 0, 1, 1], [], []>} : vector<16x32xf32>, vector<32x32xf32>, vector<16x32xf32> -> vector<16x32xf32>
    %35 = arith.addf %33, %34 : vector<16x32xf32>
    %36 = math.tanh %35 : vector<16x32xf32>
    %37 = arith.mulf %22, %9 : vector<16x32xf32>
    %cst_19 = arith.constant 1.000000e+00 : f32
    %38 = vector.broadcast %cst_19 : f32 to vector<16x32xf32>
    %39 = arith.subf %38, %22 : vector<16x32xf32>
    %40 = arith.mulf %39, %36 : vector<16x32xf32>
    %41 = arith.addf %37, %40 : vector<16x32xf32>
    %42 = vector.extract_strided_slice %8 {offsets = [16, 0], sizes = [16, 96], strides = [1, 1]} : vector<128x96xf32> to vector<16x96xf32>
    %cst_20 = arith.constant dense<0.000000e+00> : vector<16x96xf32>
    %43 = tpu.matmul %0, %42, %cst_20 {dimension_numbers = #tpu.dot_dimension_numbers<[1], [0], [0], [1], [0, 0, 1, 1], [], []>} : vector<16x16xf32>, vector<16x96xf32>, vector<16x96xf32> -> vector<16x96xf32>
    %44 = arith.addf %43, %5 : vector<16x96xf32>
    %cst_21 = arith.constant dense<0.000000e+00> : vector<16x32xf32>
    %45 = tpu.matmul %0, %41, %cst_21 {dimension_numbers = #tpu.dot_dimension_numbers<[1], [0], [0], [1], [0, 0, 1, 1], [], []>} : vector<16x16xf32>, vector<16x32xf32>, vector<16x32xf32> -> vector<16x32xf32>
    %cst_22 = arith.constant dense<0.000000e+00> : vector<16x64xf32>
    %46 = tpu.matmul %45, %1, %cst_22 {dimension_numbers = #tpu.dot_dimension_numbers<[1], [0], [0], [1], [0, 0, 1, 1], [], []>} : vector<16x32xf32>, vector<32x64xf32>, vector<16x64xf32> -> vector<16x64xf32>
    %47 = vector.extract_strided_slice %44 {offsets = [0, 0], sizes = [16, 32], strides = [1, 1]} : vector<16x96xf32> to vector<16x32xf32>
    %48 = vector.extract_strided_slice %46 {offsets = [0, 0], sizes = [16, 32], strides = [1, 1]} : vector<16x64xf32> to vector<16x32xf32>
    %49 = arith.addf %47, %48 : vector<16x32xf32>
    %50 = arith.negf %49 : vector<16x32xf32>
    %51 = math.exp %50 : vector<16x32xf32>
    %cst_23 = arith.constant 1.000000e+00 : f32
    %52 = vector.broadcast %cst_23 : f32 to vector<16x32xf32>
    %53 = arith.addf %52, %51 : vector<16x32xf32>
    %54 = arith.divf %52, %53 : vector<16x32xf32>
    %55 = vector.extract_strided_slice %44 {offsets = [0, 32], sizes = [16, 32], strides = [1, 1]} : vector<16x96xf32> to vector<16x32xf32>
    %56 = vector.extract_strided_slice %46 {offsets = [0, 32], sizes = [16, 32], strides = [1, 1]} : vector<16x64xf32> to vector<16x32xf32>
    %57 = arith.addf %55, %56 : vector<16x32xf32>
    %58 = arith.negf %57 : vector<16x32xf32>
    %59 = math.exp %58 : vector<16x32xf32>
    %cst_24 = arith.constant 1.000000e+00 : f32
    %60 = vector.broadcast %cst_24 : f32 to vector<16x32xf32>
    %61 = arith.addf %60, %59 : vector<16x32xf32>
    %62 = arith.divf %60, %61 : vector<16x32xf32>
    %63 = arith.mulf %62, %41 : vector<16x32xf32>
    %cst_25 = arith.constant dense<0.000000e+00> : vector<16x32xf32>
    %64 = tpu.matmul %0, %63, %cst_25 {dimension_numbers = #tpu.dot_dimension_numbers<[1], [0], [0], [1], [0, 0, 1, 1], [], []>} : vector<16x16xf32>, vector<16x32xf32>, vector<16x32xf32> -> vector<16x32xf32>
    %65 = vector.extract_strided_slice %44 {offsets = [0, 64], sizes = [16, 32], strides = [1, 1]} : vector<16x96xf32> to vector<16x32xf32>
    %cst_26 = arith.constant dense<0.000000e+00> : vector<16x32xf32>
    %66 = tpu.matmul %64, %2, %cst_26 {dimension_numbers = #tpu.dot_dimension_numbers<[1], [0], [0], [1], [0, 0, 1, 1], [], []>} : vector<16x32xf32>, vector<32x32xf32>, vector<16x32xf32> -> vector<16x32xf32>
    %67 = arith.addf %65, %66 : vector<16x32xf32>
    %68 = math.tanh %67 : vector<16x32xf32>
    %69 = arith.mulf %54, %41 : vector<16x32xf32>
    %cst_27 = arith.constant 1.000000e+00 : f32
    %70 = vector.broadcast %cst_27 : f32 to vector<16x32xf32>
    %71 = arith.subf %70, %54 : vector<16x32xf32>
    %72 = arith.mulf %71, %68 : vector<16x32xf32>
    %73 = arith.addf %69, %72 : vector<16x32xf32>
    %74 = vector.extract_strided_slice %8 {offsets = [32, 0], sizes = [16, 96], strides = [1, 1]} : vector<128x96xf32> to vector<16x96xf32>
    %cst_28 = arith.constant dense<0.000000e+00> : vector<16x96xf32>
    %75 = tpu.matmul %0, %74, %cst_28 {dimension_numbers = #tpu.dot_dimension_numbers<[1], [0], [0], [1], [0, 0, 1, 1], [], []>} : vector<16x16xf32>, vector<16x96xf32>, vector<16x96xf32> -> vector<16x96xf32>
    %76 = arith.addf %75, %5 : vector<16x96xf32>
    %cst_29 = arith.constant dense<0.000000e+00> : vector<16x32xf32>
    %77 = tpu.matmul %0, %73, %cst_29 {dimension_numbers = #tpu.dot_dimension_numbers<[1], [0], [0], [1], [0, 0, 1, 1], [], []>} : vector<16x16xf32>, vector<16x32xf32>, vector<16x32xf32> -> vector<16x32xf32>
    %cst_30 = arith.constant dense<0.000000e+00> : vector<16x64xf32>
    %78 = tpu.matmul %77, %1, %cst_30 {dimension_numbers = #tpu.dot_dimension_numbers<[1], [0], [0], [1], [0, 0, 1, 1], [], []>} : vector<16x32xf32>, vector<32x64xf32>, vector<16x64xf32> -> vector<16x64xf32>
    %79 = vector.extract_strided_slice %76 {offsets = [0, 0], sizes = [16, 32], strides = [1, 1]} : vector<16x96xf32> to vector<16x32xf32>
    %80 = vector.extract_strided_slice %78 {offsets = [0, 0], sizes = [16, 32], strides = [1, 1]} : vector<16x64xf32> to vector<16x32xf32>
    %81 = arith.addf %79, %80 : vector<16x32xf32>
    %82 = arith.negf %81 : vector<16x32xf32>
    %83 = math.exp %82 : vector<16x32xf32>
    %cst_31 = arith.constant 1.000000e+00 : f32
    %84 = vector.broadcast %cst_31 : f32 to vector<16x32xf32>
    %85 = arith.addf %84, %83 : vector<16x32xf32>
    %86 = arith.divf %84, %85 : vector<16x32xf32>
    %87 = vector.extract_strided_slice %76 {offsets = [0, 32], sizes = [16, 32], strides = [1, 1]} : vector<16x96xf32> to vector<16x32xf32>
    %88 = vector.extract_strided_slice %78 {offsets = [0, 32], sizes = [16, 32], strides = [1, 1]} : vector<16x64xf32> to vector<16x32xf32>
    %89 = arith.addf %87, %88 : vector<16x32xf32>
    %90 = arith.negf %89 : vector<16x32xf32>
    %91 = math.exp %90 : vector<16x32xf32>
    %cst_32 = arith.constant 1.000000e+00 : f32
    %92 = vector.broadcast %cst_32 : f32 to vector<16x32xf32>
    %93 = arith.addf %92, %91 : vector<16x32xf32>
    %94 = arith.divf %92, %93 : vector<16x32xf32>
    %95 = arith.mulf %94, %73 : vector<16x32xf32>
    %cst_33 = arith.constant dense<0.000000e+00> : vector<16x32xf32>
    %96 = tpu.matmul %0, %95, %cst_33 {dimension_numbers = #tpu.dot_dimension_numbers<[1], [0], [0], [1], [0, 0, 1, 1], [], []>} : vector<16x16xf32>, vector<16x32xf32>, vector<16x32xf32> -> vector<16x32xf32>
    %97 = vector.extract_strided_slice %76 {offsets = [0, 64], sizes = [16, 32], strides = [1, 1]} : vector<16x96xf32> to vector<16x32xf32>
    %cst_34 = arith.constant dense<0.000000e+00> : vector<16x32xf32>
    %98 = tpu.matmul %96, %2, %cst_34 {dimension_numbers = #tpu.dot_dimension_numbers<[1], [0], [0], [1], [0, 0, 1, 1], [], []>} : vector<16x32xf32>, vector<32x32xf32>, vector<16x32xf32> -> vector<16x32xf32>
    %99 = arith.addf %97, %98 : vector<16x32xf32>
    %100 = math.tanh %99 : vector<16x32xf32>
    %101 = arith.mulf %86, %73 : vector<16x32xf32>
    %cst_35 = arith.constant 1.000000e+00 : f32
    %102 = vector.broadcast %cst_35 : f32 to vector<16x32xf32>
    %103 = arith.subf %102, %86 : vector<16x32xf32>
    %104 = arith.mulf %103, %100 : vector<16x32xf32>
    %105 = arith.addf %101, %104 : vector<16x32xf32>
    %106 = vector.extract_strided_slice %8 {offsets = [48, 0], sizes = [16, 96], strides = [1, 1]} : vector<128x96xf32> to vector<16x96xf32>
    %cst_36 = arith.constant dense<0.000000e+00> : vector<16x96xf32>
    %107 = tpu.matmul %0, %106, %cst_36 {dimension_numbers = #tpu.dot_dimension_numbers<[1], [0], [0], [1], [0, 0, 1, 1], [], []>} : vector<16x16xf32>, vector<16x96xf32>, vector<16x96xf32> -> vector<16x96xf32>
    %108 = arith.addf %107, %5 : vector<16x96xf32>
    %cst_37 = arith.constant dense<0.000000e+00> : vector<16x32xf32>
    %109 = tpu.matmul %0, %105, %cst_37 {dimension_numbers = #tpu.dot_dimension_numbers<[1], [0], [0], [1], [0, 0, 1, 1], [], []>} : vector<16x16xf32>, vector<16x32xf32>, vector<16x32xf32> -> vector<16x32xf32>
    %cst_38 = arith.constant dense<0.000000e+00> : vector<16x64xf32>
    %110 = tpu.matmul %109, %1, %cst_38 {dimension_numbers = #tpu.dot_dimension_numbers<[1], [0], [0], [1], [0, 0, 1, 1], [], []>} : vector<16x32xf32>, vector<32x64xf32>, vector<16x64xf32> -> vector<16x64xf32>
    %111 = vector.extract_strided_slice %108 {offsets = [0, 0], sizes = [16, 32], strides = [1, 1]} : vector<16x96xf32> to vector<16x32xf32>
    %112 = vector.extract_strided_slice %110 {offsets = [0, 0], sizes = [16, 32], strides = [1, 1]} : vector<16x64xf32> to vector<16x32xf32>
    %113 = arith.addf %111, %112 : vector<16x32xf32>
    %114 = arith.negf %113 : vector<16x32xf32>
    %115 = math.exp %114 : vector<16x32xf32>
    %cst_39 = arith.constant 1.000000e+00 : f32
    %116 = vector.broadcast %cst_39 : f32 to vector<16x32xf32>
    %117 = arith.addf %116, %115 : vector<16x32xf32>
    %118 = arith.divf %116, %117 : vector<16x32xf32>
    %119 = vector.extract_strided_slice %108 {offsets = [0, 32], sizes = [16, 32], strides = [1, 1]} : vector<16x96xf32> to vector<16x32xf32>
    %120 = vector.extract_strided_slice %110 {offsets = [0, 32], sizes = [16, 32], strides = [1, 1]} : vector<16x64xf32> to vector<16x32xf32>
    %121 = arith.addf %119, %120 : vector<16x32xf32>
    %122 = arith.negf %121 : vector<16x32xf32>
    %123 = math.exp %122 : vector<16x32xf32>
    %cst_40 = arith.constant 1.000000e+00 : f32
    %124 = vector.broadcast %cst_40 : f32 to vector<16x32xf32>
    %125 = arith.addf %124, %123 : vector<16x32xf32>
    %126 = arith.divf %124, %125 : vector<16x32xf32>
    %127 = arith.mulf %126, %105 : vector<16x32xf32>
    %cst_41 = arith.constant dense<0.000000e+00> : vector<16x32xf32>
    %128 = tpu.matmul %0, %127, %cst_41 {dimension_numbers = #tpu.dot_dimension_numbers<[1], [0], [0], [1], [0, 0, 1, 1], [], []>} : vector<16x16xf32>, vector<16x32xf32>, vector<16x32xf32> -> vector<16x32xf32>
    %129 = vector.extract_strided_slice %108 {offsets = [0, 64], sizes = [16, 32], strides = [1, 1]} : vector<16x96xf32> to vector<16x32xf32>
    %cst_42 = arith.constant dense<0.000000e+00> : vector<16x32xf32>
    %130 = tpu.matmul %128, %2, %cst_42 {dimension_numbers = #tpu.dot_dimension_numbers<[1], [0], [0], [1], [0, 0, 1, 1], [], []>} : vector<16x32xf32>, vector<32x32xf32>, vector<16x32xf32> -> vector<16x32xf32>
    %131 = arith.addf %129, %130 : vector<16x32xf32>
    %132 = math.tanh %131 : vector<16x32xf32>
    %133 = arith.mulf %118, %105 : vector<16x32xf32>
    %cst_43 = arith.constant 1.000000e+00 : f32
    %134 = vector.broadcast %cst_43 : f32 to vector<16x32xf32>
    %135 = arith.subf %134, %118 : vector<16x32xf32>
    %136 = arith.mulf %135, %132 : vector<16x32xf32>
    %137 = arith.addf %133, %136 : vector<16x32xf32>
    %138 = vector.extract_strided_slice %8 {offsets = [64, 0], sizes = [16, 96], strides = [1, 1]} : vector<128x96xf32> to vector<16x96xf32>
    %cst_44 = arith.constant dense<0.000000e+00> : vector<16x96xf32>
    %139 = tpu.matmul %0, %138, %cst_44 {dimension_numbers = #tpu.dot_dimension_numbers<[1], [0], [0], [1], [0, 0, 1, 1], [], []>} : vector<16x16xf32>, vector<16x96xf32>, vector<16x96xf32> -> vector<16x96xf32>
    %140 = arith.addf %139, %5 : vector<16x96xf32>
    %cst_45 = arith.constant dense<0.000000e+00> : vector<16x32xf32>
    %141 = tpu.matmul %0, %137, %cst_45 {dimension_numbers = #tpu.dot_dimension_numbers<[1], [0], [0], [1], [0, 0, 1, 1], [], []>} : vector<16x16xf32>, vector<16x32xf32>, vector<16x32xf32> -> vector<16x32xf32>
    %cst_46 = arith.constant dense<0.000000e+00> : vector<16x64xf32>
    %142 = tpu.matmul %141, %1, %cst_46 {dimension_numbers = #tpu.dot_dimension_numbers<[1], [0], [0], [1], [0, 0, 1, 1], [], []>} : vector<16x32xf32>, vector<32x64xf32>, vector<16x64xf32> -> vector<16x64xf32>
    %143 = vector.extract_strided_slice %140 {offsets = [0, 0], sizes = [16, 32], strides = [1, 1]} : vector<16x96xf32> to vector<16x32xf32>
    %144 = vector.extract_strided_slice %142 {offsets = [0, 0], sizes = [16, 32], strides = [1, 1]} : vector<16x64xf32> to vector<16x32xf32>
    %145 = arith.addf %143, %144 : vector<16x32xf32>
    %146 = arith.negf %145 : vector<16x32xf32>
    %147 = math.exp %146 : vector<16x32xf32>
    %cst_47 = arith.constant 1.000000e+00 : f32
    %148 = vector.broadcast %cst_47 : f32 to vector<16x32xf32>
    %149 = arith.addf %148, %147 : vector<16x32xf32>
    %150 = arith.divf %148, %149 : vector<16x32xf32>
    %151 = vector.extract_strided_slice %140 {offsets = [0, 32], sizes = [16, 32], strides = [1, 1]} : vector<16x96xf32> to vector<16x32xf32>
    %152 = vector.extract_strided_slice %142 {offsets = [0, 32], sizes = [16, 32], strides = [1, 1]} : vector<16x64xf32> to vector<16x32xf32>
    %153 = arith.addf %151, %152 : vector<16x32xf32>
    %154 = arith.negf %153 : vector<16x32xf32>
    %155 = math.exp %154 : vector<16x32xf32>
    %cst_48 = arith.constant 1.000000e+00 : f32
    %156 = vector.broadcast %cst_48 : f32 to vector<16x32xf32>
    %157 = arith.addf %156, %155 : vector<16x32xf32>
    %158 = arith.divf %156, %157 : vector<16x32xf32>
    %159 = arith.mulf %158, %137 : vector<16x32xf32>
    %cst_49 = arith.constant dense<0.000000e+00> : vector<16x32xf32>
    %160 = tpu.matmul %0, %159, %cst_49 {dimension_numbers = #tpu.dot_dimension_numbers<[1], [0], [0], [1], [0, 0, 1, 1], [], []>} : vector<16x16xf32>, vector<16x32xf32>, vector<16x32xf32> -> vector<16x32xf32>
    %161 = vector.extract_strided_slice %140 {offsets = [0, 64], sizes = [16, 32], strides = [1, 1]} : vector<16x96xf32> to vector<16x32xf32>
    %cst_50 = arith.constant dense<0.000000e+00> : vector<16x32xf32>
    %162 = tpu.matmul %160, %2, %cst_50 {dimension_numbers = #tpu.dot_dimension_numbers<[1], [0], [0], [1], [0, 0, 1, 1], [], []>} : vector<16x32xf32>, vector<32x32xf32>, vector<16x32xf32> -> vector<16x32xf32>
    %163 = arith.addf %161, %162 : vector<16x32xf32>
    %164 = math.tanh %163 : vector<16x32xf32>
    %165 = arith.mulf %150, %137 : vector<16x32xf32>
    %cst_51 = arith.constant 1.000000e+00 : f32
    %166 = vector.broadcast %cst_51 : f32 to vector<16x32xf32>
    %167 = arith.subf %166, %150 : vector<16x32xf32>
    %168 = arith.mulf %167, %164 : vector<16x32xf32>
    %169 = arith.addf %165, %168 : vector<16x32xf32>
    %170 = vector.extract_strided_slice %8 {offsets = [80, 0], sizes = [16, 96], strides = [1, 1]} : vector<128x96xf32> to vector<16x96xf32>
    %cst_52 = arith.constant dense<0.000000e+00> : vector<16x96xf32>
    %171 = tpu.matmul %0, %170, %cst_52 {dimension_numbers = #tpu.dot_dimension_numbers<[1], [0], [0], [1], [0, 0, 1, 1], [], []>} : vector<16x16xf32>, vector<16x96xf32>, vector<16x96xf32> -> vector<16x96xf32>
    %172 = arith.addf %171, %5 : vector<16x96xf32>
    %cst_53 = arith.constant dense<0.000000e+00> : vector<16x32xf32>
    %173 = tpu.matmul %0, %169, %cst_53 {dimension_numbers = #tpu.dot_dimension_numbers<[1], [0], [0], [1], [0, 0, 1, 1], [], []>} : vector<16x16xf32>, vector<16x32xf32>, vector<16x32xf32> -> vector<16x32xf32>
    %cst_54 = arith.constant dense<0.000000e+00> : vector<16x64xf32>
    %174 = tpu.matmul %173, %1, %cst_54 {dimension_numbers = #tpu.dot_dimension_numbers<[1], [0], [0], [1], [0, 0, 1, 1], [], []>} : vector<16x32xf32>, vector<32x64xf32>, vector<16x64xf32> -> vector<16x64xf32>
    %175 = vector.extract_strided_slice %172 {offsets = [0, 0], sizes = [16, 32], strides = [1, 1]} : vector<16x96xf32> to vector<16x32xf32>
    %176 = vector.extract_strided_slice %174 {offsets = [0, 0], sizes = [16, 32], strides = [1, 1]} : vector<16x64xf32> to vector<16x32xf32>
    %177 = arith.addf %175, %176 : vector<16x32xf32>
    %178 = arith.negf %177 : vector<16x32xf32>
    %179 = math.exp %178 : vector<16x32xf32>
    %cst_55 = arith.constant 1.000000e+00 : f32
    %180 = vector.broadcast %cst_55 : f32 to vector<16x32xf32>
    %181 = arith.addf %180, %179 : vector<16x32xf32>
    %182 = arith.divf %180, %181 : vector<16x32xf32>
    %183 = vector.extract_strided_slice %172 {offsets = [0, 32], sizes = [16, 32], strides = [1, 1]} : vector<16x96xf32> to vector<16x32xf32>
    %184 = vector.extract_strided_slice %174 {offsets = [0, 32], sizes = [16, 32], strides = [1, 1]} : vector<16x64xf32> to vector<16x32xf32>
    %185 = arith.addf %183, %184 : vector<16x32xf32>
    %186 = arith.negf %185 : vector<16x32xf32>
    %187 = math.exp %186 : vector<16x32xf32>
    %cst_56 = arith.constant 1.000000e+00 : f32
    %188 = vector.broadcast %cst_56 : f32 to vector<16x32xf32>
    %189 = arith.addf %188, %187 : vector<16x32xf32>
    %190 = arith.divf %188, %189 : vector<16x32xf32>
    %191 = arith.mulf %190, %169 : vector<16x32xf32>
    %cst_57 = arith.constant dense<0.000000e+00> : vector<16x32xf32>
    %192 = tpu.matmul %0, %191, %cst_57 {dimension_numbers = #tpu.dot_dimension_numbers<[1], [0], [0], [1], [0, 0, 1, 1], [], []>} : vector<16x16xf32>, vector<16x32xf32>, vector<16x32xf32> -> vector<16x32xf32>
    %193 = vector.extract_strided_slice %172 {offsets = [0, 64], sizes = [16, 32], strides = [1, 1]} : vector<16x96xf32> to vector<16x32xf32>
    %cst_58 = arith.constant dense<0.000000e+00> : vector<16x32xf32>
    %194 = tpu.matmul %192, %2, %cst_58 {dimension_numbers = #tpu.dot_dimension_numbers<[1], [0], [0], [1], [0, 0, 1, 1], [], []>} : vector<16x32xf32>, vector<32x32xf32>, vector<16x32xf32> -> vector<16x32xf32>
    %195 = arith.addf %193, %194 : vector<16x32xf32>
    %196 = math.tanh %195 : vector<16x32xf32>
    %197 = arith.mulf %182, %169 : vector<16x32xf32>
    %cst_59 = arith.constant 1.000000e+00 : f32
    %198 = vector.broadcast %cst_59 : f32 to vector<16x32xf32>
    %199 = arith.subf %198, %182 : vector<16x32xf32>
    %200 = arith.mulf %199, %196 : vector<16x32xf32>
    %201 = arith.addf %197, %200 : vector<16x32xf32>
    %202 = vector.extract_strided_slice %8 {offsets = [96, 0], sizes = [16, 96], strides = [1, 1]} : vector<128x96xf32> to vector<16x96xf32>
    %cst_60 = arith.constant dense<0.000000e+00> : vector<16x96xf32>
    %203 = tpu.matmul %0, %202, %cst_60 {dimension_numbers = #tpu.dot_dimension_numbers<[1], [0], [0], [1], [0, 0, 1, 1], [], []>} : vector<16x16xf32>, vector<16x96xf32>, vector<16x96xf32> -> vector<16x96xf32>
    %204 = arith.addf %203, %5 : vector<16x96xf32>
    %cst_61 = arith.constant dense<0.000000e+00> : vector<16x32xf32>
    %205 = tpu.matmul %0, %201, %cst_61 {dimension_numbers = #tpu.dot_dimension_numbers<[1], [0], [0], [1], [0, 0, 1, 1], [], []>} : vector<16x16xf32>, vector<16x32xf32>, vector<16x32xf32> -> vector<16x32xf32>
    %cst_62 = arith.constant dense<0.000000e+00> : vector<16x64xf32>
    %206 = tpu.matmul %205, %1, %cst_62 {dimension_numbers = #tpu.dot_dimension_numbers<[1], [0], [0], [1], [0, 0, 1, 1], [], []>} : vector<16x32xf32>, vector<32x64xf32>, vector<16x64xf32> -> vector<16x64xf32>
    %207 = vector.extract_strided_slice %204 {offsets = [0, 0], sizes = [16, 32], strides = [1, 1]} : vector<16x96xf32> to vector<16x32xf32>
    %208 = vector.extract_strided_slice %206 {offsets = [0, 0], sizes = [16, 32], strides = [1, 1]} : vector<16x64xf32> to vector<16x32xf32>
    %209 = arith.addf %207, %208 : vector<16x32xf32>
    %210 = arith.negf %209 : vector<16x32xf32>
    %211 = math.exp %210 : vector<16x32xf32>
    %cst_63 = arith.constant 1.000000e+00 : f32
    %212 = vector.broadcast %cst_63 : f32 to vector<16x32xf32>
    %213 = arith.addf %212, %211 : vector<16x32xf32>
    %214 = arith.divf %212, %213 : vector<16x32xf32>
    %215 = vector.extract_strided_slice %204 {offsets = [0, 32], sizes = [16, 32], strides = [1, 1]} : vector<16x96xf32> to vector<16x32xf32>
    %216 = vector.extract_strided_slice %206 {offsets = [0, 32], sizes = [16, 32], strides = [1, 1]} : vector<16x64xf32> to vector<16x32xf32>
    %217 = arith.addf %215, %216 : vector<16x32xf32>
    %218 = arith.negf %217 : vector<16x32xf32>
    %219 = math.exp %218 : vector<16x32xf32>
    %cst_64 = arith.constant 1.000000e+00 : f32
    %220 = vector.broadcast %cst_64 : f32 to vector<16x32xf32>
    %221 = arith.addf %220, %219 : vector<16x32xf32>
    %222 = arith.divf %220, %221 : vector<16x32xf32>
    %223 = arith.mulf %222, %201 : vector<16x32xf32>
    %cst_65 = arith.constant dense<0.000000e+00> : vector<16x32xf32>
    %224 = tpu.matmul %0, %223, %cst_65 {dimension_numbers = #tpu.dot_dimension_numbers<[1], [0], [0], [1], [0, 0, 1, 1], [], []>} : vector<16x16xf32>, vector<16x32xf32>, vector<16x32xf32> -> vector<16x32xf32>
    %225 = vector.extract_strided_slice %204 {offsets = [0, 64], sizes = [16, 32], strides = [1, 1]} : vector<16x96xf32> to vector<16x32xf32>
    %cst_66 = arith.constant dense<0.000000e+00> : vector<16x32xf32>
    %226 = tpu.matmul %224, %2, %cst_66 {dimension_numbers = #tpu.dot_dimension_numbers<[1], [0], [0], [1], [0, 0, 1, 1], [], []>} : vector<16x32xf32>, vector<32x32xf32>, vector<16x32xf32> -> vector<16x32xf32>
    %227 = arith.addf %225, %226 : vector<16x32xf32>
    %228 = math.tanh %227 : vector<16x32xf32>
    %229 = arith.mulf %214, %201 : vector<16x32xf32>
    %cst_67 = arith.constant 1.000000e+00 : f32
    %230 = vector.broadcast %cst_67 : f32 to vector<16x32xf32>
    %231 = arith.subf %230, %214 : vector<16x32xf32>
    %232 = arith.mulf %231, %228 : vector<16x32xf32>
    %233 = arith.addf %229, %232 : vector<16x32xf32>
    %234 = vector.extract_strided_slice %8 {offsets = [112, 0], sizes = [16, 96], strides = [1, 1]} : vector<128x96xf32> to vector<16x96xf32>
    %cst_68 = arith.constant dense<0.000000e+00> : vector<16x96xf32>
    %235 = tpu.matmul %0, %234, %cst_68 {dimension_numbers = #tpu.dot_dimension_numbers<[1], [0], [0], [1], [0, 0, 1, 1], [], []>} : vector<16x16xf32>, vector<16x96xf32>, vector<16x96xf32> -> vector<16x96xf32>
    %236 = arith.addf %235, %5 : vector<16x96xf32>
    %cst_69 = arith.constant dense<0.000000e+00> : vector<16x32xf32>
    %237 = tpu.matmul %0, %233, %cst_69 {dimension_numbers = #tpu.dot_dimension_numbers<[1], [0], [0], [1], [0, 0, 1, 1], [], []>} : vector<16x16xf32>, vector<16x32xf32>, vector<16x32xf32> -> vector<16x32xf32>
    %cst_70 = arith.constant dense<0.000000e+00> : vector<16x64xf32>
    %238 = tpu.matmul %237, %1, %cst_70 {dimension_numbers = #tpu.dot_dimension_numbers<[1], [0], [0], [1], [0, 0, 1, 1], [], []>} : vector<16x32xf32>, vector<32x64xf32>, vector<16x64xf32> -> vector<16x64xf32>
    %239 = vector.extract_strided_slice %236 {offsets = [0, 0], sizes = [16, 32], strides = [1, 1]} : vector<16x96xf32> to vector<16x32xf32>
    %240 = vector.extract_strided_slice %238 {offsets = [0, 0], sizes = [16, 32], strides = [1, 1]} : vector<16x64xf32> to vector<16x32xf32>
    %241 = arith.addf %239, %240 : vector<16x32xf32>
    %242 = arith.negf %241 : vector<16x32xf32>
    %243 = math.exp %242 : vector<16x32xf32>
    %cst_71 = arith.constant 1.000000e+00 : f32
    %244 = vector.broadcast %cst_71 : f32 to vector<16x32xf32>
    %245 = arith.addf %244, %243 : vector<16x32xf32>
    %246 = arith.divf %244, %245 : vector<16x32xf32>
    %247 = vector.extract_strided_slice %236 {offsets = [0, 32], sizes = [16, 32], strides = [1, 1]} : vector<16x96xf32> to vector<16x32xf32>
    %248 = vector.extract_strided_slice %238 {offsets = [0, 32], sizes = [16, 32], strides = [1, 1]} : vector<16x64xf32> to vector<16x32xf32>
    %249 = arith.addf %247, %248 : vector<16x32xf32>
    %250 = arith.negf %249 : vector<16x32xf32>
    %251 = math.exp %250 : vector<16x32xf32>
    %cst_72 = arith.constant 1.000000e+00 : f32
    %252 = vector.broadcast %cst_72 : f32 to vector<16x32xf32>
    %253 = arith.addf %252, %251 : vector<16x32xf32>
    %254 = arith.divf %252, %253 : vector<16x32xf32>
    %255 = arith.mulf %254, %233 : vector<16x32xf32>
    %cst_73 = arith.constant dense<0.000000e+00> : vector<16x32xf32>
    %256 = tpu.matmul %0, %255, %cst_73 {dimension_numbers = #tpu.dot_dimension_numbers<[1], [0], [0], [1], [0, 0, 1, 1], [], []>} : vector<16x16xf32>, vector<16x32xf32>, vector<16x32xf32> -> vector<16x32xf32>
    %257 = vector.extract_strided_slice %236 {offsets = [0, 64], sizes = [16, 32], strides = [1, 1]} : vector<16x96xf32> to vector<16x32xf32>
    %cst_74 = arith.constant dense<0.000000e+00> : vector<16x32xf32>
    %258 = tpu.matmul %256, %2, %cst_74 {dimension_numbers = #tpu.dot_dimension_numbers<[1], [0], [0], [1], [0, 0, 1, 1], [], []>} : vector<16x32xf32>, vector<32x32xf32>, vector<16x32xf32> -> vector<16x32xf32>
    %259 = arith.addf %257, %258 : vector<16x32xf32>
    %260 = math.tanh %259 : vector<16x32xf32>
    %261 = arith.mulf %246, %233 : vector<16x32xf32>
    %cst_75 = arith.constant 1.000000e+00 : f32
    %262 = vector.broadcast %cst_75 : f32 to vector<16x32xf32>
    %263 = arith.subf %262, %246 : vector<16x32xf32>
    %264 = arith.mulf %263, %260 : vector<16x32xf32>
    %265 = arith.addf %261, %264 : vector<16x32xf32>
    %c0_76 = arith.constant 0 : index
    %c0_77 = arith.constant 0 : index
    %266 = vector.load %arg6[%c0_76, %c0_77] : memref<32x2xf32, #tpu.memory_space<vmem>>, vector<32x2xf32>
    %cst_78 = arith.constant dense<0.000000e+00> : vector<16x2xf32>
    %267 = tpu.matmul %265, %266, %cst_78 {dimension_numbers = #tpu.dot_dimension_numbers<[1], [0], [0], [1], [0, 0, 1, 1], [], []>} : vector<16x32xf32>, vector<32x2xf32>, vector<16x2xf32> -> vector<16x2xf32>
    %c0_79 = arith.constant 0 : index
    %c0_80 = arith.constant 0 : index
    %268 = vector.load %arg7[%c0_79, %c0_80] : memref<1x2xf32, #tpu.memory_space<vmem>>, vector<1x2xf32>
    %269 = vector.broadcast %268 : vector<1x2xf32> to vector<16x2xf32>
    %270 = arith.addf %267, %269 : vector<16x2xf32>
    %cst_81 = arith.constant 0.000000e+00 : f32
    %271 = vector.broadcast %cst_81 : f32 to vector<16x2xf32>
    %272 = arith.maximumf %270, %271 : vector<16x2xf32>
    %cst_82 = arith.constant dense<0xFF800000> : vector<16xf32>
    %273 = vector.multi_reduction <maximumf>, %272, %cst_82 [1] : vector<16x2xf32> to vector<16xf32>
    %274 = vector.shape_cast %273 : vector<16xf32> to vector<16x1xf32>
    %275 = vector.broadcast %274 : vector<16x1xf32> to vector<16x2xf32>
    %276 = arith.subf %272, %275 : vector<16x2xf32>
    %277 = math.exp %276 : vector<16x2xf32>
    %cst_83 = arith.constant dense<0.000000e+00> : vector<16xf32>
    %278 = vector.multi_reduction <add>, %277, %cst_83 [1] : vector<16x2xf32> to vector<16xf32>
    %279 = vector.shape_cast %278 : vector<16xf32> to vector<16x1xf32>
    %280 = math.log %279 : vector<16x1xf32>
    %281 = arith.addf %280, %274 : vector<16x1xf32>
    %282 = vector.broadcast %281 : vector<16x1xf32> to vector<16x2xf32>
    %283 = arith.subf %272, %282 : vector<16x2xf32>
    %c0_84 = arith.constant 0 : index
    %c0_85 = arith.constant 0 : index
    %284 = vector.load %arg8[%c0_84, %c0_85] : memref<16x2xf32, #tpu.memory_space<vmem>>, vector<16x2xf32>
    tpu.vector_store %arg8[%c0_84, %c0_85], %283 {strides = array<i32>} : memref<16x2xf32, #tpu.memory_space<vmem>>, vector<16x2xf32>,
    return
  }
}

</mosaic_0001>

<bundles_post_ra>
// kernel: kagrnn_forward.1
= control target key start
LH: loop header
LB: loop body
LE: loop exit
PB: predicated region body
PF: predicated region fallthrough
CT: control target
= control target key end

     0   :  { %vm112_vm0 = vcmask 1041408   ;;  %vm63_vm1 = vcmask 15360   ;;  %vm261_vm2 = vcmask 130048   ;;  %v4790_v7 = vmov 0.0   ;;  %s4791_s24 = smov 96   ;;  %s4792_s11 = smov 64   ;;  %s5540_s2 = inlined_call_operand.vmem [shape: f32[2,96], index: 2, kind: input, shape index: {}]   ;;  %s5541_s0 = inlined_call_operand.vmem [shape: f32[128,2], index: 0, kind: input, shape index: {}]   ;;  %s5542_s1 = inlined_call_operand.vmem [shape: f32[16,16], index: 1, kind: input, shape index: {}]   ;;  %s5543_s3 = inlined_call_operand.vmem [shape: f32[32,64], index: 3, kind: input, shape index: {}]   ;;  %s5544_s5 = inlined_call_operand.vmem [shape: f32[1,96], index: 5, kind: input, shape index: {}]   ;;  %s5545_s4 = inlined_call_operand.vmem [shape: f32[32,32], index: 4, kind: input, shape index: {}]   ;;  %s5546_s6 = inlined_call_operand.vmem [shape: f32[32,2], index: 6, kind: input, shape index: {}]   ;;  %s5547_s7 = inlined_call_operand.vmem [shape: f32[1,2], index: 7, kind: input, shape index: {}]   ;;  %s5548_s8 = inlined_call_operand.vmem [shape: f32[16,2], index: 8, kind: output, shape index: {}]  }
   0x1   :  { %v62_v0 = vld [vmem:[%s5540_s2] sm:$0x3]  ;;  %v47_v2 = vld [vmem:[%s5541_s0 + $0x8] sm:$0xff]  ;;  %v4871_v8 = vld [vmem:[%s5543_s3 + $0x18] sm:$0xff]  ;;  %vm418_vm3 = vcmask 261120  }
   0x2   :  { %v46_v1 = vld [vmem:[%s5541_s0] sm:$0xff]  ;;  %4292 = vmatprep.subr.msk.mxu0 %vm112_vm0, %v62_v0  ;;  %v4860_v6 = vld [vmem:[%s5542_s1 + $0x8] sm:$0xff]  ;;  %v4878_v9 = vld [vmem:[%s5543_s3 + $0x10] sm:$0xff] }
   0x3   :  { %4294 = vmatprep.mubr.msk.f32.mxu0 %vm63_vm1, %v46_v1  ;;  %4293 = vmatpush3.msk.msra.mxu0 %vm112_vm0, %v62_v0  ;;  %v4853_v3 = vld [vmem:[%s5542_s1] sm:$0xff]  ;;  %v4885_v10 = vld [vmem:[%s5543_s3 + $0x8] sm:$0xff]  ;;  %v4930_v35 = vld [vmem:[%s5545_s4 + $0x18] sm:$0xff] }
   0x4   :  { %4295 = vmatmul.mubr.msk.f32.vlgmr.msra.gmra.mxu0 %vm63_vm1, %v47_v2  ;;  %4322 = vmatprep.mubr.msk.f32.mxu1 %vm261_vm2, %v4853_v3  ;;  %v4892_v11 = vld [vmem:[%s5543_s3] sm:$0xff]  ;;  %v4935_v36 = vld [vmem:[%s5545_s4 + $0x10] sm:$0xff]  ;;  %v4946_v37 = vld [vmem:[%s5545_s4 + $0x8] sm:$0xff] }
   0x5   :  { %v4903_v16 = vld [vmem:[%s5544_s5] ss:$0 sm:$0xff]  ;;  %v48_v43 = vld [vmem:[%s5541_s0 + $0x10] sm:$0xff]  ;;  %v49_v44 = vld [vmem:[%s5541_s0 + $0x18] sm:$0xff] }
   0x6   :  { %v4953_v38 = vld [vmem:[%s5545_s4] sm:$0xff]  ;;  %4297 = vmatprep.mubr.msk.f32.mxu0 %vm63_vm1, %v48_v43  ;;  %v51_v46 = vld [vmem:[%s5541_s0 + $0x28] sm:$0xff]  ;;  %v52_v47 = vld [vmem:[%s5541_s0 + $0x30] sm:$0xff] }
   0x7   :  { %v50_v45 = vld [vmem:[%s5541_s0 + $0x20] sm:$0xff]  ;;  %v53_v48 = vld [vmem:[%s5541_s0 + $0x38] sm:$0xff]  ;;  %v55_v50 = vld [vmem:[%s5541_s0 + $0x48] sm:$0xff] }
   0x8   :  { %4298 = vmatmul.mubr.msk.f32.gmra.mxu0 %vm63_vm1, %v49_v44  ;;  %v54_v49 = vld [vmem:[%s5541_s0 + $0x40] sm:$0xff]  ;;  %v56_v51 = vld [vmem:[%s5541_s0 + $0x50] sm:$0xff]  ;;  %v57_v52 = vld [vmem:[%s5541_s0 + $0x58] sm:$0xff] }
   0x9   :  { %4300 = vmatprep.mubr.msk.f32.mxu0 %vm63_vm1, %v50_v45  ;;  %v58_v55 = vld [vmem:[%s5541_s0 + $0x60] sm:$0xff]  ;;  %v59_v56 = vld [vmem:[%s5541_s0 + $0x68] sm:$0xff]  ;;  %v60_v59 = vld [vmem:[%s5541_s0 + $0x70] sm:$0xff] }
   0xa   :  { %v61_v60 = vld [vmem:[%s5541_s0 + $0x78] sm:$0xff]  ;;  %s4793_s0 = smov 32  }
   0xc   :  { %4301 = vmatmul.mubr.msk.f32.gmra.mxu0 %vm63_vm1, %v51_v46 }
   0xd   :  { %4303 = vmatprep.mubr.msk.f32.mxu0 %vm63_vm1, %v52_v47 }
  0x10   :  { %4304 = vmatmul.mubr.msk.f32.gmra.mxu0 %vm63_vm1, %v53_v48 }
  0x11   :  { %4306 = vmatprep.mubr.msk.f32.mxu0 %vm63_vm1, %v54_v49 }
  0x14   :  { %4307 = vmatmul.mubr.msk.f32.gmra.mxu0 %vm63_vm1, %v55_v50 }
  0x15   :  { %4309 = vmatprep.mubr.msk.f32.mxu0 %vm63_vm1, %v56_v51 }
  0x18   :  { %4310 = vmatmul.mubr.msk.f32.gmra.mxu0 %vm63_vm1, %v57_v52 }
  0x19   :  { %4312 = vmatprep.mubr.msk.f32.mxu0 %vm63_vm1, %v58_v55 }
  0x1c   :  { %4313 = vmatmul.mubr.msk.f32.gmra.mxu0 %vm63_vm1, %v59_v56 }
  0x1d   :  { %4315 = vmatprep.mubr.msk.f32.mxu0 %vm63_vm1, %v60_v59 }
  0x20   :  { %4316 = vmatmul.mubr.msk.f32.gmra.mxu0 %vm63_vm1, %v61_v60 }
  0x21   :  { %4370 = vmatprep.mubr.msk.f32.mxu0 %vm261_vm2, %v4853_v3 }
  0xc4   :  { %v4296_v4 = vpop.f32.mrf.mxu0 }
  0xc5   :  { %4318 = vmatprep.subr.mxu1 %v4296_v4 }
  0xc6   :  { %v182_v5 = vpop.f32.mrf.mxu0  ;;  %4319 = vmatpush3.msra.mxu1 %v4296_v4 }
  0xc7   :  { %4320 = vmatprep.subr.mxu1 %v182_v5 }
  0xc8   :  { %4321 = vmatpush3.msra.mxu1 %v182_v5  ;;  %v4299_v63 = vpop.f32.mrf.mxu0 }
  0xc9   :  { %4323 = vmatmul.mubr.msk.f32.vlgmr.msra.gmra.mxu1 %vm261_vm2, %v4860_v6  ;;  %4325 = vmatprep.subr.mxu1 %v4790_v7 }
  0xca   :  { %4326 = vmatpush3.msra.mxu1 %v4790_v7  ;;  %4327 = vmatprep.mubr.msk.f32.mxu1 %vm261_vm2, %v4853_v3  ;;  %v192_v0 = vpop.f32.mrf.mxu0 }
  0xcb   :  { %4330 = vmatprep.subr.mxu1 %v4871_v8 }
  0xcd   :  { %4328 = vmatmul.mubr.msk.f32.vlgmr.msra.gmra.mxu1 %vm261_vm2, %v4860_v6 }
  0xce   :  { %4331 = vmatpush3.msra.mxu1 %v4871_v8 }
  0xcf   :  { %4332 = vmatprep.subr.mxu1 %v4878_v9 }
  0xd0   :  { %4333 = vmatpush3.msra.mxu1 %v4878_v9 }
  0xd1   :  { %4334 = vmatprep.subr.mxu1 %v4885_v10 }
  0xd2   :  { %4335 = vmatpush3.msra.mxu1 %v4885_v10 }
  0xd3   :  { %4336 = vmatprep.subr.mxu1 %v4892_v11 }
  0xd4   :  { %4337 = vmatpush3.msra.mxu1 %v4892_v11 }
 0x189   :  { %v4324_v12 = vpop.f32.mrf.mxu1 }
 0x18a   :  { %v4906_v17 = vadd.f32 %v4324_v12, %v4903_v16 }
 0x18b   :  { %v334_v13 = vpop.f32.mrf.mxu1 }
 0x18c   :  { %v4909_v19 = vadd.f32 %v4903_v16, %v334_v13 }
 0x18d   :  { %v4329_v14 = vpop.f32.mrf.mxu1 }
 0x18f   :  { %v409_v15 = vpop.f32.mrf.mxu1 }
 0x190   :  { %4338 = vmatprep.mubr.msk.f32.mxu1 %vm418_vm3, %v409_v15  ;;  %v4302_v15 = vpop.f32.mrf.mxu0 }
 0x191   :  { %4339 = vmatmul.mubr.msk.f32.vlgmr.msra.gmra.mxu1 %vm418_vm3, %v4329_v14 }
 0x192   :  { %4345 = vmatprep.mubr.msk.f32.mxu1 %vm261_vm2, %v4853_v3 }
 0x251   :  { %v4340_v18 = vpop.f32.mrf.mxu1 }
 0x252   :  { %v501_v20 = vadd.f32 %v4340_v18, %v4906_v17 }
 0x253   :  { %v491_v21 = vpop.f32.mrf.mxu1 }
 0x254   :  { %v3986_v22 = vmul.f32 -1.442695, %v501_v20  ;;  %v500_v23 = vadd.f32 %v491_v21, %v4909_v19 }
 0x256   :  { %4675 = vpow2.f32 %v3986_v22  ;;  %v3985_v24 = vmul.f32 -1.442695, %v500_v23 }
 0x258   :  { %4677 = vpow2.f32 %v3985_v24 }
 0x263   :  { %v4676_v25 = vpop.eup %4675 }
 0x264   :  { %v509_v26 = vadd.f32 1.0, %v4676_v25 }
 0x265   :  { %v4678_v27 = vpop.eup %4677 }
 0x266   :  { %4679 = vrcp.f32 %v509_v26  ;;  %v508_v28 = vadd.f32 1.0, %v4678_v27 }
 0x268   :  { %4681 = vrcp.f32 %v508_v28 }
 0x273   :  { %v4913_v29 = vpop.eup %4679 }
 0x274   :  { %v4916_v30 = vmul.f32 0.0, %v4913_v29  ;;  %v693_v1 = vsub.f32 1.0, %v4913_v29 }
 0x275   :  { %v4918_v31 = vpop.eup %4681 }
 0x276   :  { %520 = vrot.lane.b32.xlu0 %v4916_v30, %s4791_s24  ;;  %v4923_v32 = vmul.f32 0.0, %v4918_v31  ;;  %v692_v7 = vsub.f32 1.0, %v4918_v31 }
 0x27a   :  { %518 = vrot.lane.b32.xlu0 %v4923_v32, %s4791_s24 }
 0x2e8   :  { %v521_v33 = vpop.permute.xlu0 %520 }
 0x2e9   :  { %4341 = vmatprep.subr.mxu1 %v521_v33 }
 0x2ea   :  { %4342 = vmatpush3.msra.mxu1 %v521_v33 }
 0x2ec   :  { %v519_v34 = vpop.permute.xlu0 %518 }
 0x2ed   :  { %4343 = vmatprep.subr.mxu1 %v519_v34 }
 0x2ee   :  { %4344 = vmatpush3.msra.mxu1 %v519_v34 }
 0x2ef   :  { %4346 = vmatmul.mubr.msk.f32.vlgmr.msra.gmra.mxu1 %vm261_vm2, %v4860_v6  ;;  %4348 = vmatprep.subr.mxu1 %v4930_v35 }
 0x2f0   :  { %4349 = vmatpush3.msra.mxu1 %v4930_v35 }
 0x2f1   :  { %4350 = vmatprep.subr.mxu1 %v4935_v36 }
 0x2f2   :  { %4351 = vmatpush3.msra.mxu1 %v4935_v36 }
 0x2f3   :  { %4352 = vmatprep.subr.mxu1 %v4946_v37 }
 0x2f4   :  { %4353 = vmatpush3.msra.mxu1 %v4946_v37 }
 0x2f5   :  { %4354 = vmatprep.subr.mxu1 %v4953_v38 }
 0x2f6   :  { %4355 = vmatpush3.msra.mxu1 %v4953_v38 }
 0x2f7   :  { %4359 = vmatprep.subr.mxu1 %v4299_v63 }
 0x3af   :  { %v4347_v39 = vpop.f32.mrf.mxu1 }
 0x3b1   :  { %v590_v40 = vpop.f32.mrf.mxu1 }
 0x3b2   :  { %4356 = vmatprep.mubr.msk.f32.mxu1 %vm418_vm3, %v590_v40 }
 0x3b3   :  { %4357 = vmatmul.mubr.msk.f32.vlgmr.msra.gmra.mxu1 %vm418_vm3, %v4347_v39 }
 0x3b4   :  { %4363 = vmatprep.mubr.msk.f32.mxu1 %vm261_vm2, %v4853_v3  ;;  %4360 = vmatpush3.msra.mxu1 %v4299_v63 }
 0x3b5   :  { %4361 = vmatprep.subr.mxu1 %v192_v0 }
 0x3b6   :  { %4362 = vmatpush3.msra.mxu1 %v192_v0 }
 0x3b7   :  { %4373 = vmatprep.subr.mxu1 %v4871_v8  ;;  %4364 = vmatmul.mubr.msk.f32.vlgmr.msra.gmra.mxu1 %vm261_vm2, %v4860_v6 }
 0x3b8   :  { %4374 = vmatpush3.msra.mxu1 %v4871_v8 }
 0x3b9   :  { %4375 = vmatprep.subr.mxu1 %v4878_v9 }
 0x3ba   :  { %4376 = vmatpush3.msra.mxu1 %v4878_v9 }
 0x3bb   :  { %4377 = vmatprep.subr.mxu1 %v4885_v10 }
 0x3bc   :  { %4378 = vmatpush3.msra.mxu1 %v4885_v10 }
 0x3bd   :  { %4379 = vmatprep.subr.mxu1 %v4892_v11 }
 0x3be   :  { %4380 = vmatpush3.msra.mxu1 %v4892_v11 }
 0x3bf   :  { %4402 = vmatprep.subr.mxu1 %v4302_v15 }
 0x473   :  { %v4358_v41 = vpop.f32.mrf.mxu1 }
 0x474   :  { %684 = vrot.lane.b32.xlu1 %v4358_v41, %s4792_s11 }
 0x475   :  { %v671_v42 = vpop.f32.mrf.mxu1 }
 0x478   :  { %682 = vrot.lane.b32.xlu1 %v671_v42, %s4792_s11 }
 0x4e6   :  { %v685_v53 = vpop.permute.xlu1 %684 }
 0x4e7   :  { %v689_v54 = vadd.f32 %v685_v53, %v4906_v17  ;;  %v202_v17 = vpop.f32.mrf.mxu0 }
 0x4e9   :  { %4683 = vtanh.f32 %v689_v54  ;;  %v5055_v18 = vpop.f32.mrf.mxu0 }
 0x4ea   :  { %v683_v57 = vpop.permute.xlu1 %682 }
 0x4eb   :  { %v688_v58 = vadd.f32 %v683_v57, %v4909_v19  ;;  %v5057_v19 = vpop.f32.mrf.mxu0 }
 0x4ed   :  { %4685 = vtanh.f32 %v688_v58  ;;  %v5059_v20 = vpop.f32.mrf.mxu0 }
 0x4ef   :  { %v5061_v21 = vpop.f32.mrf.mxu0 }
 0x4f1   :  { %v5063_v22 = vpop.f32.mrf.mxu0 }
 0x4f3   :  { %v5065_v23 = vpop.f32.mrf.mxu0 }
 0x4f5   :  { %v5067_v24 = vpop.f32.mrf.mxu0 }
 0x4f6   :  { %v4684_v61 = vpop.eup %4683 }
 0x4f7   :  { %698 = vrot.lane.b32.xlu0 %v4684_v61, %s4792_s11  ;;  %v5069_v25 = vpop.f32.mrf.mxu0 }
 0x4f9   :  { %v5071_v26 = vpop.f32.mrf.mxu0 }
 0x4fa   :  { %v4686_v62 = vpop.eup %4685 }
 0x4fb   :  { %696 = vrot.lane.b32.xlu1 %v4686_v62, %s4792_s11  ;;  %v5073_v27 = vpop.f32.mrf.mxu0 }
 0x569   :  { %v699_v2 = vpop.permute.xlu0 %698 }
 0x56a   :  { %v703_v4 = vmul.f32 %v699_v2, %v693_v1 }
 0x56c   :  { %v5032_v5 = vadd.f32 %v703_v4, %v4916_v30  ;;  %v4365_v30 = vpop.f32.mrf.mxu1 }
 0x56d   :  { %v697_v12 = vpop.permute.xlu1 %696 }
 0x56e   :  { %v702_v13 = vmul.f32 %v697_v12, %v692_v7  ;;  %955 = vrot.lane.b32.xlu0 %v5032_v5, %s4793_s0  ;;  %4366 = vmatprep.subr.mxu0 %v5032_v5  ;;  %v772_v31 = vpop.f32.mrf.mxu1 }
 0x56f   :  { %4367 = vmatpush3.msra.mxu0 %v5032_v5  ;;  %v773_v34 = vadd.f32 %v4903_v16, %v772_v31 }
 0x570   :  { %v5043_v14 = vadd.f32 %v702_v13, %v4923_v32  ;;  %v778_v32 = vadd.f32 %v4365_v30, %v4903_v16 }
 0x572   :  { %953 = vrot.lane.b32.xlu1 %v5043_v14, %s4793_s0  ;;  %4368 = vmatprep.subr.mxu0 %v5043_v14 }
 0x573   :  { %4369 = vmatpush3.msra.mxu0 %v5043_v14 }
 0x574   :  { %4371 = vmatmul.mubr.msk.f32.vlgmr.msra.gmra.mxu0 %vm261_vm2, %v4860_v6 }
 0x575   :  { %4388 = vmatprep.mubr.msk.f32.mxu0 %vm261_vm2, %v4853_v3 }
 0x5e0   :  { %v956_v49 = vpop.permute.xlu0 %955 }
 0x5e4   :  { %v954_v52 = vpop.permute.xlu1 %953 }
 0x634   :  { %v4372_v28 = vpop.f32.mrf.mxu0 }
 0x636   :  { %v847_v29 = vpop.f32.mrf.mxu0 }
 0x637   :  { %4381 = vmatprep.mubr.msk.f32.mxu1 %vm418_vm3, %v847_v29 }
 0x638   :  { %4382 = vmatmul.mubr.msk.f32.vlgmr.msra.gmra.mxu1 %vm418_vm3, %v4372_v28 }
 0x639   :  { %4403 = vmatpush3.msra.mxu1 %v4302_v15  ;;  %4406 = vmatprep.mubr.msk.f32.mxu1 %vm261_vm2, %v4853_v3 }
 0x63a   :  { %4404 = vmatprep.subr.mxu1 %v202_v17 }
 0x63b   :  { %4405 = vmatpush3.msra.mxu1 %v202_v17 }
 0x63c   :  { %4407 = vmatmul.mubr.msk.f32.vlgmr.msra.gmra.mxu1 %vm261_vm2, %v4860_v6 }
 0x63d   :  { %4413 = vmatprep.mubr.msk.f32.mxu1 %vm261_vm2, %v4853_v3 }
 0x6f8   :  { %v4383_v33 = vpop.f32.mrf.mxu1 }
 0x6f9   :  { %v938_v39 = vadd.f32 %v4383_v33, %v778_v32 }
 0x6fa   :  { %v928_v40 = vpop.f32.mrf.mxu1 }
 0x6fb   :  { %v3998_v41 = vmul.f32 -1.442695, %v938_v39  ;;  %v937_v42 = vadd.f32 %v928_v40, %v773_v34 }
 0x6fd   :  { %4687 = vpow2.f32 %v3998_v41  ;;  %v3997_v43 = vmul.f32 -1.442695, %v937_v42 }
 0x6ff   :  { %4689 = vpow2.f32 %v3997_v43 }
 0x70a   :  { %v4688_v44 = vpop.eup %4687 }
 0x70b   :  { %v946_v45 = vadd.f32 1.0, %v4688_v44 }
 0x70c   :  { %v4690_v46 = vpop.eup %4689 }
 0x70d   :  { %4691 = vrcp.f32 %v946_v45  ;;  %v945_v47 = vadd.f32 1.0, %v4690_v46 }
 0x70f   :  { %4693 = vrcp.f32 %v945_v47 }
 0x71a   :  { %v4692_v48 = vpop.eup %4691 }
 0x71b   :  { %v960_v50 = vmul.f32 %v4692_v48, %v956_v49  ;;  %v1140_v2 = vsub.f32 1.0, %v4692_v48  ;;  %v1138_v7 = vmul.f32 %v4692_v48, %v5032_v5  ;;  %v4408_v5 = vpop.f32.mrf.mxu1 }
 0x71c   :  { %v4694_v51 = vpop.eup %4693  ;;  %v1225_v33 = vadd.f32 %v4408_v5, %v4903_v16 }
 0x71d   :  { %965 = vrot.lane.b32.xlu0 %v960_v50, %s4791_s24  ;;  %v959_v53 = vmul.f32 %v4694_v51, %v954_v52  ;;  %v1139_v13 = vsub.f32 1.0, %v4694_v51  ;;  %v1137_v28 = vmul.f32 %v4694_v51, %v5043_v14  ;;  %v1219_v14 = vpop.f32.mrf.mxu1 }
 0x71e   :  { %v1220_v39 = vadd.f32 %v4903_v16, %v1219_v14 }
 0x71f   :  { %963 = vrot.lane.b32.xlu1 %v959_v53, %s4791_s24 }
 0x78f   :  { %v966_v54 = vpop.permute.xlu0 %965 }
 0x790   :  { %4384 = vmatprep.subr.mxu0 %v966_v54 }
 0x791   :  { %4385 = vmatpush3.msra.mxu0 %v966_v54  ;;  %v964_v55 = vpop.permute.xlu1 %963 }
 0x792   :  { %4386 = vmatprep.subr.mxu0 %v964_v55 }
 0x793   :  { %4387 = vmatpush3.msra.mxu0 %v964_v55 }
 0x794   :  { %4389 = vmatmul.mubr.msk.f32.vlgmr.msra.gmra.mxu0 %vm261_vm2, %v4860_v6  ;;  %4391 = vmatprep.subr.mxu0 %v4930_v35 }
 0x795   :  { %4392 = vmatpush3.msra.mxu0 %v4930_v35 }
 0x796   :  { %4393 = vmatprep.subr.mxu0 %v4935_v36 }
 0x797   :  { %4394 = vmatpush3.msra.mxu0 %v4935_v36 }
 0x798   :  { %4395 = vmatprep.subr.mxu0 %v4946_v37 }
 0x799   :  { %4396 = vmatpush3.msra.mxu0 %v4946_v37 }
 0x79a   :  { %4397 = vmatprep.subr.mxu0 %v4953_v38 }
 0x79b   :  { %4398 = vmatpush3.msra.mxu0 %v4953_v38 }
 0x79c   :  { %4416 = vmatprep.subr.mxu0 %v4871_v8 }
 0x854   :  { %v4390_v56 = vpop.f32.mrf.mxu0 }
 0x856   :  { %v1035_v57 = vpop.f32.mrf.mxu0 }
 0x857   :  { %4399 = vmatprep.mubr.msk.f32.mxu0 %vm418_vm3, %v1035_v57 }
 0x858   :  { %4400 = vmatmul.mubr.msk.f32.vlgmr.msra.gmra.mxu0 %vm418_vm3, %v4390_v56 }
 0x859   :  { %4417 = vmatpush3.msra.mxu0 %v4871_v8 }
 0x85a   :  { %4418 = vmatprep.subr.mxu0 %v4878_v9 }
 0x85b   :  { %4419 = vmatpush3.msra.mxu0 %v4878_v9 }
 0x85c   :  { %4420 = vmatprep.subr.mxu0 %v4885_v10 }
 0x85d   :  { %4421 = vmatpush3.msra.mxu0 %v4885_v10 }
 0x85e   :  { %4422 = vmatprep.subr.mxu0 %v4892_v11 }
 0x85f   :  { %4423 = vmatpush3.msra.mxu0 %v4892_v11 }
 0x860   :  { %4445 = vmatprep.subr.mxu0 %v5055_v18 }
 0x918   :  { %v4401_v58 = vpop.f32.mrf.mxu0 }
 0x919   :  { %1129 = vrot.lane.b32.xlu0 %v4401_v58, %s4792_s11 }
 0x91a   :  { %v1116_v59 = vpop.f32.mrf.mxu0 }
 0x91b   :  { %1127 = vrot.lane.b32.xlu1 %v1116_v59, %s4792_s11 }
 0x98b   :  { %v1130_v60 = vpop.permute.xlu0 %1129 }
 0x98c   :  { %v1134_v61 = vadd.f32 %v1130_v60, %v778_v32 }
 0x98d   :  { %v1128_v62 = vpop.permute.xlu1 %1127 }
 0x98e   :  { %4695 = vtanh.f32 %v1134_v61  ;;  %v1133_v63 = vadd.f32 %v1128_v62, %v773_v34 }
 0x990   :  { %4697 = vtanh.f32 %v1133_v63 }
 0x99b   :  { %v4696_v0 = vpop.eup %4695 }
 0x99c   :  { %1145 = vrot.lane.b32.xlu0 %v4696_v0, %s4792_s11 }
 0x99d   :  { %v4698_v1 = vpop.eup %4697 }
 0x99e   :  { %1143 = vrot.lane.b32.xlu1 %v4698_v1, %s4792_s11 }
 0xa0e   :  { %v1146_v4 = vpop.permute.xlu0 %1145 }
 0xa0f   :  { %v1150_v12 = vmul.f32 %v1146_v4, %v1140_v2 }
 0xa10   :  { %v1144_v15 = vpop.permute.xlu1 %1143 }
 0xa11   :  { %v5113_v17 = vadd.f32 %v1150_v12, %v1138_v7  ;;  %v1149_v29 = vmul.f32 %v1144_v15, %v1139_v13 }
 0xa13   :  { %v5116_v30 = vadd.f32 %v1149_v29, %v1137_v28  ;;  %1402 = vrot.lane.b32.xlu0 %v5113_v17, %s4793_s0  ;;  %4409 = vmatprep.subr.mxu1 %v5113_v17 }
 0xa14   :  { %4410 = vmatpush3.msra.mxu1 %v5113_v17 }
 0xa15   :  { %1400 = vrot.lane.b32.xlu1 %v5116_v30, %s4793_s0  ;;  %4411 = vmatprep.subr.mxu1 %v5116_v30 }
 0xa16   :  { %4412 = vmatpush3.msra.mxu1 %v5116_v30 }
 0xa17   :  { %4414 = vmatmul.mubr.msk.f32.vlgmr.msra.gmra.mxu1 %vm261_vm2, %v4860_v6 }
 0xa18   :  { %4431 = vmatprep.mubr.msk.f32.mxu1 %vm261_vm2, %v4853_v3 }
 0xa85   :  { %v1403_v48 = vpop.permute.xlu0 %1402 }
 0xa87   :  { %v1401_v51 = vpop.permute.xlu1 %1400 }
 0xad7   :  { %v4415_v31 = vpop.f32.mrf.mxu1 }
 0xad9   :  { %v1294_v32 = vpop.f32.mrf.mxu1 }
 0xada   :  { %4424 = vmatprep.mubr.msk.f32.mxu0 %vm418_vm3, %v1294_v32 }
 0xadb   :  { %4425 = vmatmul.mubr.msk.f32.vlgmr.msra.gmra.mxu0 %vm418_vm3, %v4415_v31 }
 0xadc   :  { %4446 = vmatpush3.msra.mxu0 %v5055_v18  ;;  %4449 = vmatprep.mubr.msk.f32.mxu0 %vm261_vm2, %v4853_v3 }
 0xadd   :  { %4447 = vmatprep.subr.mxu0 %v5057_v19 }
 0xade   :  { %4448 = vmatpush3.msra.mxu0 %v5057_v19 }
 0xadf   :  { %4450 = vmatmul.mubr.msk.f32.vlgmr.msra.gmra.mxu0 %vm261_vm2, %v4860_v6 }
 0xae0   :  { %4456 = vmatprep.mubr.msk.f32.mxu0 %vm261_vm2, %v4853_v3 }
 0xb9b   :  { %v4426_v34 = vpop.f32.mrf.mxu0 }
 0xb9c   :  { %v1385_v40 = vadd.f32 %v4426_v34, %v1225_v33 }
 0xb9d   :  { %v1375_v18 = vpop.f32.mrf.mxu0 }
 0xb9e   :  { %v4010_v41 = vmul.f32 -1.442695, %v1385_v40  ;;  %v1384_v42 = vadd.f32 %v1375_v18, %v1220_v39 }
 0xba0   :  { %4699 = vpow2.f32 %v4010_v41  ;;  %v4009_v43 = vmul.f32 -1.442695, %v1384_v42 }
 0xba2   :  { %4701 = vpow2.f32 %v4009_v43 }
 0xbad   :  { %v4700_v44 = vpop.eup %4699 }
 0xbae   :  { %v1393_v19 = vadd.f32 1.0, %v4700_v44 }
 0xbaf   :  { %v4702_v45 = vpop.eup %4701 }
 0xbb0   :  { %4703 = vrcp.f32 %v1393_v19  ;;  %v1392_v46 = vadd.f32 1.0, %v4702_v45 }
 0xbb2   :  { %4705 = vrcp.f32 %v1392_v46 }
 0xbbd   :  { %v4704_v47 = vpop.eup %4703 }
 0xbbe   :  { %v1407_v49 = vmul.f32 %v4704_v47, %v1403_v48  ;;  %v1587_v1 = vsub.f32 1.0, %v4704_v47  ;;  %v1585_v4 = vmul.f32 %v4704_v47, %v5113_v17  ;;  %v4451_v17 = vpop.f32.mrf.mxu0 }
 0xbbf   :  { %v4706_v50 = vpop.eup %4705  ;;  %v1672_v32 = vadd.f32 %v4451_v17, %v4903_v16 }
 0xbc0   :  { %1412 = vrot.lane.b32.xlu0 %v1407_v49, %s4791_s24  ;;  %v1406_v52 = vmul.f32 %v4706_v50, %v1401_v51  ;;  %v1586_v12 = vsub.f32 1.0, %v4706_v50  ;;  %v1584_v28 = vmul.f32 %v4706_v50, %v5116_v30  ;;  %v1666_v30 = vpop.f32.mrf.mxu0 }
 0xbc1   :  { %v1667_v34 = vadd.f32 %v4903_v16, %v1666_v30 }
 0xbc2   :  { %1410 = vrot.lane.b32.xlu1 %v1406_v52, %s4791_s24 }
 0xc32   :  { %v1413_v53 = vpop.permute.xlu0 %1412 }
 0xc33   :  { %4427 = vmatprep.subr.mxu1 %v1413_v53 }
 0xc34   :  { %4428 = vmatpush3.msra.mxu1 %v1413_v53  ;;  %v1411_v54 = vpop.permute.xlu1 %1410 }
 0xc35   :  { %4429 = vmatprep.subr.mxu1 %v1411_v54 }
 0xc36   :  { %4430 = vmatpush3.msra.mxu1 %v1411_v54 }
 0xc37   :  { %4432 = vmatmul.mubr.msk.f32.vlgmr.msra.gmra.mxu1 %vm261_vm2, %v4860_v6  ;;  %4434 = vmatprep.subr.mxu1 %v4930_v35 }
 0xc38   :  { %4435 = vmatpush3.msra.mxu1 %v4930_v35 }
 0xc39   :  { %4436 = vmatprep.subr.mxu1 %v4935_v36 }
 0xc3a   :  { %4437 = vmatpush3.msra.mxu1 %v4935_v36 }
 0xc3b   :  { %4438 = vmatprep.subr.mxu1 %v4946_v37 }
 0xc3c   :  { %4439 = vmatpush3.msra.mxu1 %v4946_v37 }
 0xc3d   :  { %4440 = vmatprep.subr.mxu1 %v4953_v38 }
 0xc3e   :  { %4441 = vmatpush3.msra.mxu1 %v4953_v38 }
 0xc3f   :  { %4459 = vmatprep.subr.mxu1 %v4871_v8 }
 0xcf7   :  { %v4433_v55 = vpop.f32.mrf.mxu1 }
 0xcf9   :  { %v1482_v56 = vpop.f32.mrf.mxu1 }
 0xcfa   :  { %4442 = vmatprep.mubr.msk.f32.mxu1 %vm418_vm3, %v1482_v56 }
 0xcfb   :  { %4443 = vmatmul.mubr.msk.f32.vlgmr.msra.gmra.mxu1 %vm418_vm3, %v4433_v55 }
 0xcfc   :  { %4460 = vmatpush3.msra.mxu1 %v4871_v8 }
 0xcfd   :  { %4461 = vmatprep.subr.mxu1 %v4878_v9 }
 0xcfe   :  { %4462 = vmatpush3.msra.mxu1 %v4878_v9 }
 0xcff   :  { %4463 = vmatprep.subr.mxu1 %v4885_v10 }
 0xd00   :  { %4464 = vmatpush3.msra.mxu1 %v4885_v10 }
 0xd01   :  { %4465 = vmatprep.subr.mxu1 %v4892_v11 }
 0xd02   :  { %4466 = vmatpush3.msra.mxu1 %v4892_v11 }
 0xd03   :  { %4488 = vmatprep.subr.mxu1 %v5059_v20 }
 0xdbb   :  { %v4444_v57 = vpop.f32.mrf.mxu1 }
 0xdbc   :  { %1576 = vrot.lane.b32.xlu0 %v4444_v57, %s4792_s11 }
 0xdbd   :  { %v1563_v58 = vpop.f32.mrf.mxu1 }
 0xdbe   :  { %1574 = vrot.lane.b32.xlu1 %v1563_v58, %s4792_s11 }
 0xe2e   :  { %v1577_v59 = vpop.permute.xlu0 %1576 }
 0xe2f   :  { %v1581_v60 = vadd.f32 %v1577_v59, %v1225_v33 }
 0xe30   :  { %v1575_v61 = vpop.permute.xlu1 %1574 }
 0xe31   :  { %4707 = vtanh.f32 %v1581_v60  ;;  %v1580_v62 = vadd.f32 %v1575_v61, %v1220_v39 }
 0xe33   :  { %4709 = vtanh.f32 %v1580_v62 }
 0xe3e   :  { %v4708_v63 = vpop.eup %4707 }
 0xe3f   :  { %1592 = vrot.lane.b32.xlu0 %v4708_v63, %s4792_s11 }
 0xe40   :  { %v4710_v0 = vpop.eup %4709 }
 0xe41   :  { %1590 = vrot.lane.b32.xlu1 %v4710_v0, %s4792_s11 }
 0xeb1   :  { %v1593_v2 = vpop.permute.xlu0 %1592 }
 0xeb2   :  { %v1597_v7 = vmul.f32 %v1593_v2, %v1587_v1 }
 0xeb3   :  { %v1591_v13 = vpop.permute.xlu1 %1590 }
 0xeb4   :  { %v5171_v15 = vadd.f32 %v1597_v7, %v1585_v4  ;;  %v1596_v29 = vmul.f32 %v1591_v13, %v1586_v12 }
 0xeb6   :  { %v5174_v5 = vadd.f32 %v1596_v29, %v1584_v28  ;;  %1849 = vrot.lane.b32.xlu0 %v5171_v15, %s4793_s0  ;;  %4452 = vmatprep.subr.mxu0 %v5171_v15 }
 0xeb7   :  { %4453 = vmatpush3.msra.mxu0 %v5171_v15 }
 0xeb8   :  { %1847 = vrot.lane.b32.xlu1 %v5174_v5, %s4793_s0  ;;  %4454 = vmatprep.subr.mxu0 %v5174_v5 }
 0xeb9   :  { %4455 = vmatpush3.msra.mxu0 %v5174_v5 }
 0xeba   :  { %4457 = vmatmul.mubr.msk.f32.vlgmr.msra.gmra.mxu0 %vm261_vm2, %v4860_v6 }
 0xebb   :  { %4474 = vmatprep.mubr.msk.f32.mxu0 %vm261_vm2, %v4853_v3 }
 0xf28   :  { %v1850_v45 = vpop.permute.xlu0 %1849 }
 0xf2a   :  { %v1848_v48 = vpop.permute.xlu1 %1847 }
 0xf7a   :  { %v4458_v14 = vpop.f32.mrf.mxu0 }
 0xf7c   :  { %v1741_v31 = vpop.f32.mrf.mxu0 }
 0xf7d   :  { %4467 = vmatprep.mubr.msk.f32.mxu1 %vm418_vm3, %v1741_v31 }
 0xf7e   :  { %4468 = vmatmul.mubr.msk.f32.vlgmr.msra.gmra.mxu1 %vm418_vm3, %v4458_v14 }
 0xf7f   :  { %4489 = vmatpush3.msra.mxu1 %v5059_v20  ;;  %4492 = vmatprep.mubr.msk.f32.mxu1 %vm261_vm2, %v4853_v3 }
 0xf80   :  { %4490 = vmatprep.subr.mxu1 %v5061_v21 }
 0xf81   :  { %4491 = vmatpush3.msra.mxu1 %v5061_v21 }
 0xf82   :  { %4493 = vmatmul.mubr.msk.f32.vlgmr.msra.gmra.mxu1 %vm261_vm2, %v4860_v6 }
 0xf83   :  { %4499 = vmatprep.mubr.msk.f32.mxu1 %vm261_vm2, %v4853_v3 }
0x103e   :  { %v4469_v33 = vpop.f32.mrf.mxu1 }
0x103f   :  { %v1832_v39 = vadd.f32 %v4469_v33, %v1672_v32 }
0x1040   :  { %v1822_v20 = vpop.f32.mrf.mxu1 }
0x1041   :  { %v4022_v40 = vmul.f32 -1.442695, %v1832_v39  ;;  %v1831_v18 = vadd.f32 %v1822_v20, %v1667_v34 }
0x1043   :  { %4711 = vpow2.f32 %v4022_v40  ;;  %v4021_v41 = vmul.f32 -1.442695, %v1831_v18 }
0x1045   :  { %4713 = vpow2.f32 %v4021_v41 }
0x1050   :  { %v4712_v42 = vpop.eup %4711 }
0x1051   :  { %v1840_v21 = vadd.f32 1.0, %v4712_v42 }
0x1052   :  { %v4714_v43 = vpop.eup %4713 }
0x1053   :  { %4715 = vrcp.f32 %v1840_v21  ;;  %v1839_v44 = vadd.f32 1.0, %v4714_v43 }
0x1055   :  { %4717 = vrcp.f32 %v1839_v44 }
0x1060   :  { %v4716_v19 = vpop.eup %4715 }
0x1061   :  { %v1854_v46 = vmul.f32 %v4716_v19, %v1850_v45  ;;  %v2034_v62 = vsub.f32 1.0, %v4716_v19  ;;  %v2032_v0 = vmul.f32 %v4716_v19, %v5171_v15  ;;  %v4494_v15 = vpop.f32.mrf.mxu1 }
0x1062   :  { %v4718_v47 = vpop.eup %4717  ;;  %v2119_v30 = vadd.f32 %v4494_v15, %v4903_v16 }
0x1063   :  { %1859 = vrot.lane.b32.xlu0 %v1854_v46, %s4791_s24  ;;  %v1853_v49 = vmul.f32 %v4718_v47, %v1848_v48  ;;  %v2033_v2 = vsub.f32 1.0, %v4718_v47  ;;  %v2031_v12 = vmul.f32 %v4718_v47, %v5174_v5  ;;  %v2113_v29 = vpop.f32.mrf.mxu1 }
0x1064   :  { %v2114_v31 = vadd.f32 %v4903_v16, %v2113_v29 }
0x1065   :  { %1857 = vrot.lane.b32.xlu1 %v1853_v49, %s4791_s24 }
0x10d5   :  { %v1860_v50 = vpop.permute.xlu0 %1859 }
0x10d6   :  { %4470 = vmatprep.subr.mxu0 %v1860_v50 }
0x10d7   :  { %4471 = vmatpush3.msra.mxu0 %v1860_v50  ;;  %v1858_v51 = vpop.permute.xlu1 %1857 }
0x10d8   :  { %4472 = vmatprep.subr.mxu0 %v1858_v51 }
0x10d9   :  { %4473 = vmatpush3.msra.mxu0 %v1858_v51 }
0x10da   :  { %4475 = vmatmul.mubr.msk.f32.vlgmr.msra.gmra.mxu0 %vm261_vm2, %v4860_v6  ;;  %4477 = vmatprep.subr.mxu0 %v4930_v35 }
0x10db   :  { %4478 = vmatpush3.msra.mxu0 %v4930_v35 }
0x10dc   :  { %4479 = vmatprep.subr.mxu0 %v4935_v36 }
0x10dd   :  { %4480 = vmatpush3.msra.mxu0 %v4935_v36 }
0x10de   :  { %4481 = vmatprep.subr.mxu0 %v4946_v37 }
0x10df   :  { %4482 = vmatpush3.msra.mxu0 %v4946_v37 }
0x10e0   :  { %4483 = vmatprep.subr.mxu0 %v4953_v38 }
0x10e1   :  { %4484 = vmatpush3.msra.mxu0 %v4953_v38 }
0x10e2   :  { %4502 = vmatprep.subr.mxu0 %v4871_v8 }
0x119a   :  { %v4476_v52 = vpop.f32.mrf.mxu0 }
0x119c   :  { %v1929_v53 = vpop.f32.mrf.mxu0 }
0x119d   :  { %4485 = vmatprep.mubr.msk.f32.mxu0 %vm418_vm3, %v1929_v53 }
0x119e   :  { %4486 = vmatmul.mubr.msk.f32.vlgmr.msra.gmra.mxu0 %vm418_vm3, %v4476_v52 }
0x119f   :  { %4503 = vmatpush3.msra.mxu0 %v4871_v8 }
0x11a0   :  { %4504 = vmatprep.subr.mxu0 %v4878_v9 }
0x11a1   :  { %4505 = vmatpush3.msra.mxu0 %v4878_v9 }
0x11a2   :  { %4506 = vmatprep.subr.mxu0 %v4885_v10 }
0x11a3   :  { %4507 = vmatpush3.msra.mxu0 %v4885_v10 }
0x11a4   :  { %4508 = vmatprep.subr.mxu0 %v4892_v11 }
0x11a5   :  { %4509 = vmatpush3.msra.mxu0 %v4892_v11 }
0x11a6   :  { %4531 = vmatprep.subr.mxu0 %v5063_v22 }
0x125e   :  { %v4487_v54 = vpop.f32.mrf.mxu0 }
0x125f   :  { %2023 = vrot.lane.b32.xlu0 %v4487_v54, %s4792_s11 }
0x1260   :  { %v2010_v55 = vpop.f32.mrf.mxu0 }
0x1261   :  { %2021 = vrot.lane.b32.xlu1 %v2010_v55, %s4792_s11 }
0x12d1   :  { %v2024_v56 = vpop.permute.xlu0 %2023 }
0x12d2   :  { %v2028_v57 = vadd.f32 %v2024_v56, %v1672_v32  ;;  %v5303_v56 = vld [vmem:[%s5542_s1 + $0x8] sm:$0xff] }
0x12d3   :  { %v2022_v58 = vpop.permute.xlu1 %2021 }
0x12d4   :  { %4719 = vtanh.f32 %v2028_v57  ;;  %v2027_v59 = vadd.f32 %v2022_v58, %v1667_v34  ;;  %v5310_v57 = vld [vmem:[%s5542_s1] sm:$0xff] }
0x12d6   :  { %4721 = vtanh.f32 %v2027_v59 }
0x12e1   :  { %v4720_v60 = vpop.eup %4719 }
0x12e2   :  { %2039 = vrot.lane.b32.xlu0 %v4720_v60, %s4792_s11 }
0x12e3   :  { %v4722_v61 = vpop.eup %4721 }
0x12e4   :  { %2037 = vrot.lane.b32.xlu1 %v4722_v61, %s4792_s11 }
0x1354   :  { %v2040_v63 = vpop.permute.xlu0 %2039 }
0x1355   :  { %v2044_v1 = vmul.f32 %v2040_v63, %v2034_v62  ;;  %v5328_v62 = vld [vmem:[%s5544_s5] ss:$0 sm:$0xff] }
0x1356   :  { %v2038_v4 = vpop.permute.xlu1 %2037 }
0x1357   :  { %v5229_v7 = vadd.f32 %v2044_v1, %v2032_v0  ;;  %v2043_v13 = vmul.f32 %v2038_v4, %v2033_v2 }
0x1359   :  { %v5232_v28 = vadd.f32 %v2043_v13, %v2031_v12  ;;  %2296 = vrot.lane.b32.xlu0 %v5229_v7, %s4793_s0  ;;  %4495 = vmatprep.subr.mxu1 %v5229_v7 }
0x135a   :  { %4496 = vmatpush3.msra.mxu1 %v5229_v7 }
0x135b   :  { %2294 = vrot.lane.b32.xlu1 %v5232_v28, %s4793_s0  ;;  %4497 = vmatprep.subr.mxu1 %v5232_v28 }
0x135c   :  { %4498 = vmatpush3.msra.mxu1 %v5232_v28 }
0x135d   :  { %4500 = vmatmul.mubr.msk.f32.vlgmr.msra.gmra.mxu1 %vm261_vm2, %v4860_v6 }
0x135e   :  { %4517 = vmatprep.mubr.msk.f32.mxu1 %vm261_vm2, %v4853_v3 }
0x13cd   :  { %v2295_v43 = vpop.permute.xlu1 %2294 }
0x141d   :  { %v4501_v5 = vpop.f32.mrf.mxu1 }
0x141f   :  { %v2188_v17 = vpop.f32.mrf.mxu1 }
0x1420   :  { %4510 = vmatprep.mubr.msk.f32.mxu0 %vm418_vm3, %v2188_v17 }
0x1421   :  { %4511 = vmatmul.mubr.msk.f32.vlgmr.msra.gmra.mxu0 %vm418_vm3, %v4501_v5 }
0x1422   :  { %4532 = vmatpush3.msra.mxu0 %v5063_v22  ;;  %4535 = vmatprep.mubr.msk.f32.mxu0 %vm261_vm2, %v4853_v3 }
0x1423   :  { %4533 = vmatprep.subr.mxu0 %v5065_v23 }
0x1424   :  { %4534 = vmatpush3.msra.mxu0 %v5065_v23 }
0x1425   :  { %4536 = vmatmul.mubr.msk.f32.vlgmr.msra.gmra.mxu0 %vm261_vm2, %v4860_v6 }
0x1426   :  { %4542 = vmatprep.mubr.msk.f32.mxu0 %vm261_vm2, %v4853_v3  ;;  %v2297_v3 = vpop.permute.xlu0 %2296 }
0x14e1   :  { %v4512_v14 = vpop.f32.mrf.mxu0 }
0x14e2   :  { %v2279_v32 = vadd.f32 %v4512_v14, %v2119_v30 }
0x14e3   :  { %v2269_v22 = vpop.f32.mrf.mxu0 }
0x14e4   :  { %v4034_v33 = vmul.f32 -1.442695, %v2279_v32  ;;  %v2278_v34 = vadd.f32 %v2269_v22, %v2114_v31 }
0x14e5   :  { %v4537_v58 = vpop.f32.mrf.mxu0 }
0x14e6   :  { %4723 = vpow2.f32 %v4034_v33  ;;  %v4033_v39 = vmul.f32 -1.442695, %v2278_v34  ;;  %v5348_v33 = vld [vmem:[%s5545_s4 + $0x18] sm:$0xff]  ;;  %v5355_v34 = vld [vmem:[%s5545_s4 + $0x10] sm:$0xff] }
0x14e7   :  { %v2560_v59 = vpop.f32.mrf.mxu0 }
0x14e8   :  { %4725 = vpow2.f32 %v4033_v39  ;;  %v5334_v0 = vadd.f32 %v5328_v62, %v2560_v59  ;;  %v5362_v39 = vld [vmem:[%s5545_s4 + $0x8] sm:$0xff] }
0x14f3   :  { %v4724_v20 = vpop.eup %4723 }
0x14f4   :  { %v2287_v23 = vadd.f32 1.0, %v4724_v20  ;;  %v5369_v20 = vld [vmem:[%s5545_s4] sm:$0xff] }
0x14f5   :  { %v4726_v40 = vpop.eup %4725 }
0x14f6   :  { %4727 = vrcp.f32 %v2287_v23  ;;  %v2286_v18 = vadd.f32 1.0, %v4726_v40  ;;  %v5376_v23 = vld [vmem:[%s5543_s3 + $0x18] sm:$0xff] }
0x14f8   :  { %4729 = vrcp.f32 %v2286_v18 }
0x1503   :  { %v4728_v41 = vpop.eup %4727 }
0x1504   :  { %v2301_v42 = vmul.f32 %v4728_v41, %v2297_v3  ;;  %v2479_v48 = vmul.f32 %v4728_v41, %v5229_v7  ;;  %v5392_v3 = vld [vmem:[%s5543_s3 + $0x8] sm:$0xff] }
0x1505   :  { %v4730_v21 = vpop.eup %4729 }
0x1506   :  { %2306 = vrot.lane.b32.xlu0 %v2301_v42, %s4791_s24  ;;  %v2300_v16 = vmul.f32 %v4730_v21, %v2295_v43  ;;  %v2480_v50 = vsub.f32 1.0, %v4730_v21  ;;  %v2478_v53 = vmul.f32 %v4730_v21, %v5232_v28  ;;  %v5399_v42 = vld [vmem:[%s5543_s3] sm:$0xff] }
0x1508   :  { %2304 = vrot.lane.b32.xlu1 %v2300_v16, %s4791_s24 }
0x1578   :  { %v2307_v44 = vpop.permute.xlu0 %2306 }
0x1579   :  { %4513 = vmatprep.subr.mxu1 %v2307_v44 }
0x157a   :  { %4514 = vmatpush3.msra.mxu1 %v2307_v44  ;;  %v2305_v19 = vpop.permute.xlu1 %2304 }
0x157b   :  { %4515 = vmatprep.subr.mxu1 %v2305_v19 }
0x157c   :  { %4516 = vmatpush3.msra.mxu1 %v2305_v19 }
0x157d   :  { %4518 = vmatmul.mubr.msk.f32.vlgmr.msra.gmra.mxu1 %vm261_vm2, %v4860_v6  ;;  %4520 = vmatprep.subr.mxu1 %v4930_v35 }
0x157e   :  { %4521 = vmatpush3.msra.mxu1 %v4930_v35 }
0x157f   :  { %4522 = vmatprep.subr.mxu1 %v4935_v36 }
0x1580   :  { %4523 = vmatpush3.msra.mxu1 %v4935_v36 }
0x1581   :  { %4524 = vmatprep.subr.mxu1 %v4946_v37 }
0x1582   :  { %4525 = vmatpush3.msra.mxu1 %v4946_v37 }
0x1583   :  { %4526 = vmatprep.subr.mxu1 %v4953_v38 }
0x1584   :  { %4527 = vmatpush3.msra.mxu1 %v4953_v38 }
0x1585   :  { %4545 = vmatprep.subr.mxu1 %v4871_v8 }
0x163d   :  { %v4519_v45 = vpop.f32.mrf.mxu1 }
0x163f   :  { %v2376_v6 = vpop.f32.mrf.mxu1 }
0x1640   :  { %4528 = vmatprep.mubr.msk.f32.mxu1 %vm418_vm3, %v2376_v6 }
0x1641   :  { %4529 = vmatmul.mubr.msk.f32.vlgmr.msra.gmra.mxu1 %vm418_vm3, %v4519_v45 }
0x1642   :  { %4546 = vmatpush3.msra.mxu1 %v4871_v8 }
0x1643   :  { %4547 = vmatprep.subr.mxu1 %v4878_v9 }
0x1644   :  { %4548 = vmatpush3.msra.mxu1 %v4878_v9 }
0x1645   :  { %4549 = vmatprep.subr.mxu1 %v4885_v10 }
0x1646   :  { %4550 = vmatpush3.msra.mxu1 %v4885_v10 }
0x1647   :  { %4551 = vmatprep.subr.mxu1 %v4892_v11 }
0x1648   :  { %4552 = vmatpush3.msra.mxu1 %v4892_v11  ;;  %v2481_v11 = vsub.f32 1.0, %v4728_v41  ;;  %v5385_v41 = vld [vmem:[%s5543_s3 + $0x10] sm:$0xff] }
0x1649   :  { %4574 = vmatprep.subr.mxu1 %v5067_v24 }
0x1701   :  { %v4530_v35 = vpop.f32.mrf.mxu1 }
0x1702   :  { %2470 = vrot.lane.b32.xlu0 %v4530_v35, %s4792_s11 }
0x1703   :  { %v2457_v36 = vpop.f32.mrf.mxu1 }
0x1704   :  { %2468 = vrot.lane.b32.xlu1 %v2457_v36, %s4792_s11 }
0x1774   :  { %v2471_v8 = vpop.permute.xlu0 %2470 }
0x1775   :  { %v2475_v37 = vadd.f32 %v2471_v8, %v2119_v30 }
0x1776   :  { %v2469_v38 = vpop.permute.xlu1 %2468 }
0x1777   :  { %4731 = vtanh.f32 %v2475_v37  ;;  %v2474_v9 = vadd.f32 %v2469_v38, %v2114_v31 }
0x1779   :  { %4733 = vtanh.f32 %v2474_v9 }
0x1784   :  { %v4732_v46 = vpop.eup %4731 }
0x1785   :  { %2486 = vrot.lane.b32.xlu0 %v4732_v46, %s4792_s11 }
0x1786   :  { %v4734_v10 = vpop.eup %4733 }
0x1787   :  { %2484 = vrot.lane.b32.xlu1 %v4734_v10, %s4792_s11 }
0x17f7   :  { %v2487_v47 = vpop.permute.xlu0 %2486 }
0x17f8   :  { %v2491_v49 = vmul.f32 %v2487_v47, %v2481_v11 }
0x17f9   :  { %v2485_v51 = vpop.permute.xlu1 %2484 }
0x17fa   :  { %v5287_v52 = vadd.f32 %v2491_v49, %v2479_v48  ;;  %v2490_v54 = vmul.f32 %v2485_v51, %v2480_v50 }
0x17fc   :  { %v5290_v55 = vadd.f32 %v2490_v54, %v2478_v53  ;;  %2743 = vrot.lane.b32.xlu0 %v5287_v52, %s4793_s0  ;;  %4538 = vmatprep.subr.mxu0 %v5287_v52 }
0x17fd   :  { %4539 = vmatpush3.msra.mxu0 %v5287_v52 }
0x17fe   :  { %2741 = vrot.lane.b32.xlu1 %v5290_v55, %s4793_s0  ;;  %4540 = vmatprep.subr.mxu0 %v5290_v55 }
0x17ff   :  { %4541 = vmatpush3.msra.mxu0 %v5290_v55 }
0x1800   :  { %4543 = vmatmul.mubr.msk.f32.vlgmr.msra.gmra.mxu0 %vm261_vm2, %v5303_v56 }
0x1801   :  { %4560 = vmatprep.mubr.msk.f32.mxu0 %vm261_vm2, %v5310_v57 }
0x186e   :  { %v2744_v5 = vpop.permute.xlu0 %2743 }
0x1870   :  { %v2742_v14 = vpop.permute.xlu1 %2741 }
0x18c0   :  { %v4544_v60 = vpop.f32.mrf.mxu0 }
0x18c2   :  { %v2635_v61 = vpop.f32.mrf.mxu0 }
0x18c3   :  { %4553 = vmatprep.mubr.msk.f32.mxu1 %vm418_vm3, %v2635_v61 }
0x18c4   :  { %4554 = vmatmul.mubr.msk.f32.vlgmr.msra.gmra.mxu1 %vm418_vm3, %v4544_v60 }
0x18c5   :  { %4575 = vmatpush3.msra.mxu1 %v5067_v24  ;;  %4578 = vmatprep.mubr.msk.f32.mxu1 %vm261_vm2, %v5310_v57  ;;  %v5331_v24 = vadd.f32 %v5328_v62, %v4537_v58 }
0x18c6   :  { %4576 = vmatprep.subr.mxu1 %v5069_v25 }
0x18c7   :  { %4577 = vmatpush3.msra.mxu1 %v5069_v25 }
0x18c8   :  { %4579 = vmatmul.mubr.msk.f32.vlgmr.msra.gmra.mxu1 %vm261_vm2, %v5303_v56 }
0x18c9   :  { %4585 = vmatprep.mubr.msk.f32.mxu1 %vm261_vm2, %v5310_v57 }
0x1984   :  { %v4555_v63 = vpop.f32.mrf.mxu1 }
0x1985   :  { %v2726_v25 = vadd.f32 %v4555_v63, %v5331_v24 }
0x1986   :  { %v2716_v1 = vpop.f32.mrf.mxu1 }
0x1987   :  { %v4046_v2 = vmul.f32 -1.442695, %v2726_v25  ;;  %v2725_v4 = vadd.f32 %v2716_v1, %v5334_v0 }
0x1988   :  { %v4580_v49 = vpop.f32.mrf.mxu1 }
0x1989   :  { %4735 = vpow2.f32 %v4046_v2  ;;  %v4045_v7 = vmul.f32 -1.442695, %v2725_v4  ;;  %v3013_v53 = vadd.f32 %v5328_v62, %v4580_v49 }
0x198a   :  { %v3007_v50 = vpop.f32.mrf.mxu1 }
0x198b   :  { %4737 = vpow2.f32 %v4045_v7 }
0x1996   :  { %v4736_v12 = vpop.eup %4735 }
0x1997   :  { %v2734_v13 = vadd.f32 1.0, %v4736_v12 }
0x1998   :  { %v4738_v28 = vpop.eup %4737 }
0x1999   :  { %4739 = vrcp.f32 %v2734_v13  ;;  %v2733_v15 = vadd.f32 1.0, %v4738_v28 }
0x199b   :  { %4741 = vrcp.f32 %v2733_v15 }
0x19a6   :  { %v4740_v29 = vpop.eup %4739 }
0x19a7   :  { %v2748_v17 = vmul.f32 %v4740_v29, %v2744_v5  ;;  %v2928_v36 = vsub.f32 1.0, %v4740_v29  ;;  %v2926_v37 = vmul.f32 %v4740_v29, %v5287_v52 }
0x19a8   :  { %v5338_v30 = vpop.eup %4741 }
0x19a9   :  { %2753 = vrot.lane.b32.xlu0 %v2748_v17, %s4791_s24  ;;  %v2747_v31 = vmul.f32 %v5338_v30, %v2742_v14  ;;  %v2927_v9 = vsub.f32 1.0, %v5338_v30  ;;  %v2925_v11 = vmul.f32 %v5338_v30, %v5290_v55  ;;  %v3008_v55 = vadd.f32 %v5328_v62, %v3007_v50 }
0x19ab   :  { %2751 = vrot.lane.b32.xlu1 %v2747_v31, %s4791_s24 }
0x1a1b   :  { %v2754_v32 = vpop.permute.xlu0 %2753 }
0x1a1c   :  { %4556 = vmatprep.subr.mxu0 %v2754_v32 }
0x1a1d   :  { %4557 = vmatpush3.msra.mxu0 %v2754_v32  ;;  %v2752_v22 = vpop.permute.xlu1 %2751 }
0x1a1e   :  { %4558 = vmatprep.subr.mxu0 %v2752_v22 }
0x1a1f   :  { %4559 = vmatpush3.msra.mxu0 %v2752_v22 }
0x1a20   :  { %4561 = vmatmul.mubr.msk.f32.vlgmr.msra.gmra.mxu0 %vm261_vm2, %v5303_v56  ;;  %4563 = vmatprep.subr.mxu0 %v5348_v33 }
0x1a21   :  { %4564 = vmatpush3.msra.mxu0 %v5348_v33 }
0x1a22   :  { %4565 = vmatprep.subr.mxu0 %v5355_v34 }
0x1a23   :  { %4566 = vmatpush3.msra.mxu0 %v5355_v34 }
0x1a24   :  { %4567 = vmatprep.subr.mxu0 %v5362_v39 }
0x1a25   :  { %4568 = vmatpush3.msra.mxu0 %v5362_v39 }
0x1a26   :  { %4569 = vmatprep.subr.mxu0 %v5369_v20 }
0x1a27   :  { %4570 = vmatpush3.msra.mxu0 %v5369_v20 }
0x1a28   :  { %4588 = vmatprep.subr.mxu0 %v5376_v23 }
0x1ae0   :  { %v4562_v40 = vpop.f32.mrf.mxu0 }
0x1ae2   :  { %v2823_v18 = vpop.f32.mrf.mxu0 }
0x1ae3   :  { %4571 = vmatprep.mubr.msk.f32.mxu0 %vm418_vm3, %v2823_v18 }
0x1ae4   :  { %4572 = vmatmul.mubr.msk.f32.vlgmr.msra.gmra.mxu0 %vm418_vm3, %v4562_v40 }
0x1ae5   :  { %4589 = vmatpush3.msra.mxu0 %v5376_v23 }
0x1ae6   :  { %4590 = vmatprep.subr.mxu0 %v5385_v41 }
0x1ae7   :  { %4591 = vmatpush3.msra.mxu0 %v5385_v41 }
0x1ae8   :  { %4592 = vmatprep.subr.mxu0 %v5392_v3 }
0x1ae9   :  { %4593 = vmatpush3.msra.mxu0 %v5392_v3 }
0x1aea   :  { %4594 = vmatprep.subr.mxu0 %v5399_v42 }
0x1aeb   :  { %4595 = vmatpush3.msra.mxu0 %v5399_v42 }
0x1aec   :  { %4617 = vmatprep.subr.mxu0 %v5071_v26 }
0x1ba4   :  { %v4573_v21 = vpop.f32.mrf.mxu0 }
0x1ba5   :  { %2917 = vrot.lane.b32.xlu0 %v4573_v21, %s4792_s11 }
0x1ba6   :  { %v2904_v43 = vpop.f32.mrf.mxu0 }
0x1ba7   :  { %2915 = vrot.lane.b32.xlu1 %v2904_v43, %s4792_s11 }
0x1c17   :  { %v2918_v16 = vpop.permute.xlu0 %2917 }
0x1c18   :  { %v2922_v44 = vadd.f32 %v2918_v16, %v5331_v24 }
0x1c19   :  { %v2916_v19 = vpop.permute.xlu1 %2915 }
0x1c1a   :  { %4743 = vtanh.f32 %v2922_v44  ;;  %v2921_v45 = vadd.f32 %v2916_v19, %v5334_v0 }
0x1c1c   :  { %4745 = vtanh.f32 %v2921_v45 }
0x1c27   :  { %v4744_v6 = vpop.eup %4743 }
0x1c28   :  { %2933 = vrot.lane.b32.xlu0 %v4744_v6, %s4792_s11 }
0x1c29   :  { %v4746_v35 = vpop.eup %4745 }
0x1c2a   :  { %2931 = vrot.lane.b32.xlu1 %v4746_v35, %s4792_s11 }
0x1c9a   :  { %v2934_v8 = vpop.permute.xlu0 %2933 }
0x1c9b   :  { %v2938_v38 = vmul.f32 %v2934_v8, %v2928_v36 }
0x1c9c   :  { %v2932_v46 = vpop.permute.xlu1 %2931 }
0x1c9d   :  { %v5412_v10 = vadd.f32 %v2938_v38, %v2926_v37  ;;  %v2937_v47 = vmul.f32 %v2932_v46, %v2927_v9 }
0x1c9f   :  { %v5416_v48 = vadd.f32 %v2937_v47, %v2925_v11  ;;  %3190 = vrot.lane.b32.xlu0 %v5412_v10, %s4793_s0  ;;  %4581 = vmatprep.subr.mxu1 %v5412_v10 }
0x1ca0   :  { %4582 = vmatpush3.msra.mxu1 %v5412_v10 }
0x1ca1   :  { %3188 = vrot.lane.b32.xlu1 %v5416_v48, %s4793_s0  ;;  %4583 = vmatprep.subr.mxu1 %v5416_v48 }
0x1ca2   :  { %4584 = vmatpush3.msra.mxu1 %v5416_v48 }
0x1ca3   :  { %4586 = vmatmul.mubr.msk.f32.vlgmr.msra.gmra.mxu1 %vm261_vm2, %v5303_v56 }
0x1ca4   :  { %4603 = vmatprep.mubr.msk.f32.mxu1 %vm261_vm2, %v5310_v57 }
0x1d11   :  { %v3191_v1 = vpop.permute.xlu0 %3190 }
0x1d13   :  { %v3189_v7 = vpop.permute.xlu1 %3188 }
0x1d63   :  { %v4587_v51 = vpop.f32.mrf.mxu1 }
0x1d65   :  { %v3082_v52 = vpop.f32.mrf.mxu1 }
0x1d66   :  { %4596 = vmatprep.mubr.msk.f32.mxu0 %vm418_vm3, %v3082_v52 }
0x1d67   :  { %4597 = vmatmul.mubr.msk.f32.vlgmr.msra.gmra.mxu0 %vm418_vm3, %v4587_v51 }
0x1d68   :  { %4618 = vmatpush3.msra.mxu0 %v5071_v26  ;;  %4621 = vmatprep.mubr.msk.f32.mxu0 %vm261_vm2, %v5310_v57 }
0x1d69   :  { %4619 = vmatprep.subr.mxu0 %v5073_v27 }
0x1d6a   :  { %4620 = vmatpush3.msra.mxu0 %v5073_v27 }
0x1d6b   :  { %4622 = vmatmul.mubr.msk.f32.vlgmr.msra.gmra.mxu0 %vm261_vm2, %v5303_v56 }
0x1d6c   :  { %4628 = vmatprep.mubr.msk.f32.mxu0 %vm261_vm2, %v5310_v57 }
0x1e27   :  { %v4598_v54 = vpop.f32.mrf.mxu0 }
0x1e28   :  { %v3173_v58 = vadd.f32 %v4598_v54, %v3013_v53 }
0x1e29   :  { %v3163_v26 = vpop.f32.mrf.mxu0 }
0x1e2a   :  { %v4058_v59 = vmul.f32 -1.442695, %v3173_v58  ;;  %v3172_v60 = vadd.f32 %v3163_v26, %v3008_v55 }
0x1e2b   :  { %v4623_v45 = vpop.f32.mrf.mxu0 }
0x1e2c   :  { %4747 = vpow2.f32 %v4058_v59  ;;  %v4057_v61 = vmul.f32 -1.442695, %v3172_v60  ;;  %v3460_v8 = vadd.f32 %v5328_v62, %v4623_v45 }
0x1e2d   :  { %v3454_v6 = vpop.f32.mrf.mxu0 }
0x1e2e   :  { %4749 = vpow2.f32 %v4057_v61  ;;  %v3455_v38 = vadd.f32 %v5328_v62, %v3454_v6 }
0x1e39   :  { %v4748_v24 = vpop.eup %4747 }
0x1e3a   :  { %v3181_v27 = vadd.f32 1.0, %v4748_v24 }
0x1e3b   :  { %v4750_v63 = vpop.eup %4749 }
0x1e3c   :  { %4751 = vrcp.f32 %v3181_v27  ;;  %v3180_v0 = vadd.f32 1.0, %v4750_v63  ;;  %v3837_v27 = vld [vmem:[%s5546_s6 + $0x10] sm:$0xff]  ;;  %v3836_v63 = vld [vmem:[%s5546_s6 + $0x8] sm:$0xff] }
0x1e3e   :  { %4753 = vrcp.f32 %v3180_v0  ;;  %v3835_v0 = vld [vmem:[%s5546_s6] sm:$0xff] }
0x1e49   :  { %v4752_v25 = vpop.eup %4751 }
0x1e4a   :  { %v3195_v2 = vmul.f32 %v4752_v25, %v3191_v1  ;;  %v3375_v40 = vsub.f32 1.0, %v4752_v25 }
0x1e4b   :  { %v4754_v4 = vpop.eup %4753 }
0x1e4c   :  { %3200 = vrot.lane.b32.xlu0 %v3195_v2, %s4791_s24  ;;  %v3194_v12 = vmul.f32 %v4754_v4, %v3189_v7  ;;  %v3372_v16 = vmul.f32 %v4754_v4, %v5416_v48 }
0x1e4e   :  { %3198 = vrot.lane.b32.xlu1 %v3194_v12, %s4791_s24 }
0x1ebe   :  { %v3201_v13 = vpop.permute.xlu0 %3200 }
0x1ebf   :  { %4599 = vmatprep.subr.mxu1 %v3201_v13 }
0x1ec0   :  { %4600 = vmatpush3.msra.mxu1 %v3201_v13  ;;  %v3199_v28 = vpop.permute.xlu1 %3198 }
0x1ec1   :  { %4601 = vmatprep.subr.mxu1 %v3199_v28 }
0x1ec2   :  { %4602 = vmatpush3.msra.mxu1 %v3199_v28 }
0x1ec3   :  { %4604 = vmatmul.mubr.msk.f32.vlgmr.msra.gmra.mxu1 %vm261_vm2, %v5303_v56  ;;  %4606 = vmatprep.subr.mxu1 %v5348_v33 }
0x1ec4   :  { %4607 = vmatpush3.msra.mxu1 %v5348_v33 }
0x1ec5   :  { %4608 = vmatprep.subr.mxu1 %v5355_v34 }
0x1ec6   :  { %4609 = vmatpush3.msra.mxu1 %v5355_v34 }
0x1ec7   :  { %4610 = vmatprep.subr.mxu1 %v5362_v39 }
0x1ec8   :  { %4611 = vmatpush3.msra.mxu1 %v5362_v39 }
0x1ec9   :  { %4612 = vmatprep.subr.mxu1 %v5369_v20 }
0x1eca   :  { %4613 = vmatpush3.msra.mxu1 %v5369_v20 }
0x1ecb   :  { %4631 = vmatprep.subr.mxu1 %v5376_v23 }
0x1f83   :  { %v4605_v15 = vpop.f32.mrf.mxu1 }
0x1f85   :  { %v3270_v29 = vpop.f32.mrf.mxu1 }
0x1f86   :  { %4614 = vmatprep.mubr.msk.f32.mxu1 %vm418_vm3, %v3270_v29 }
0x1f87   :  { %4615 = vmatmul.mubr.msk.f32.vlgmr.msra.gmra.mxu1 %vm418_vm3, %v4605_v15 }
0x1f88   :  { %4632 = vmatpush3.msra.mxu1 %v5376_v23 }
0x1f89   :  { %4633 = vmatprep.subr.mxu1 %v5385_v41 }
0x1f8a   :  { %4634 = vmatpush3.msra.mxu1 %v5385_v41  ;;  %v3373_v41 = vmul.f32 %v4752_v25, %v5412_v10 }
0x1f8b   :  { %4635 = vmatprep.subr.mxu1 %v5392_v3 }
0x1f8c   :  { %4636 = vmatpush3.msra.mxu1 %v5392_v3 }
0x1f8d   :  { %4637 = vmatprep.subr.mxu1 %v5399_v42 }
0x1f8e   :  { %4638 = vmatpush3.msra.mxu1 %v5399_v42  ;;  %v3374_v42 = vsub.f32 1.0, %v4754_v4 }
0x2047   :  { %v4616_v5 = vpop.f32.mrf.mxu1 }
0x2048   :  { %3364 = vrot.lane.b32.xlu0 %v4616_v5, %s4792_s11 }
0x2049   :  { %v3351_v17 = vpop.f32.mrf.mxu1 }
0x204a   :  { %3362 = vrot.lane.b32.xlu1 %v3351_v17, %s4792_s11 }
0x20ba   :  { %v3365_v30 = vpop.permute.xlu0 %3364 }
0x20bb   :  { %v3369_v14 = vadd.f32 %v3365_v30, %v3013_v53  ;;  %v4075_v30 = vld [vmem:[%s5547_s7] ss:$0 sm:$0xff] }
0x20bc   :  { %v3363_v31 = vpop.permute.xlu1 %3362 }
0x20bd   :  { %4755 = vtanh.f32 %v3369_v14  ;;  %v3368_v32 = vadd.f32 %v3363_v31, %v3008_v55 }
0x20bf   :  { %4757 = vtanh.f32 %v3368_v32 }
0x20ca   :  { %v4756_v22 = vpop.eup %4755 }
0x20cb   :  { %3380 = vrot.lane.b32.xlu0 %v4756_v22, %s4792_s11 }
0x20cc   :  { %v4758_v23 = vpop.eup %4757 }
0x20cd   :  { %3378 = vrot.lane.b32.xlu1 %v4758_v23, %s4792_s11 }
0x213d   :  { %v3381_v18 = vpop.permute.xlu0 %3380 }
0x213e   :  { %v3385_v3 = vmul.f32 %v3381_v18, %v3375_v40 }
0x213f   :  { %v3379_v21 = vpop.permute.xlu1 %3378 }
0x2140   :  { %v5470_v43 = vadd.f32 %v3385_v3, %v3373_v41  ;;  %v3384_v44 = vmul.f32 %v3379_v21, %v3374_v42 }
0x2142   :  { %v5473_v19 = vadd.f32 %v3384_v44, %v3372_v16  ;;  %3637 = vrot.lane.b32.xlu0 %v5470_v43, %s4793_s0  ;;  %4624 = vmatprep.subr.mxu0 %v5470_v43 }
0x2143   :  { %4625 = vmatpush3.msra.mxu0 %v5470_v43 }
0x2144   :  { %3635 = vrot.lane.b32.xlu1 %v5473_v19, %s4793_s0  ;;  %4626 = vmatprep.subr.mxu0 %v5473_v19 }
0x2145   :  { %4627 = vmatpush3.msra.mxu0 %v5473_v19 }
0x2146   :  { %4629 = vmatmul.mubr.msk.f32.vlgmr.msra.gmra.mxu0 %vm261_vm2, %v5303_v56 }
0x2147   :  { %4646 = vmatprep.mubr.msk.f32.mxu0 %vm261_vm2, %v5310_v57 }
0x21b4   :  { %v3638_v52 = vpop.permute.xlu0 %3637 }
0x21b6   :  { %v3636_v55 = vpop.permute.xlu1 %3635 }
0x2206   :  { %v4630_v35 = vpop.f32.mrf.mxu0 }
0x2208   :  { %v3529_v36 = vpop.f32.mrf.mxu0 }
0x2209   :  { %4639 = vmatprep.mubr.msk.f32.mxu1 %vm418_vm3, %v3529_v36 }
0x220a   :  { %4640 = vmatmul.mubr.msk.f32.vlgmr.msra.gmra.mxu1 %vm418_vm3, %v4630_v35 }
0x22ca   :  { %v4641_v37 = vpop.f32.mrf.mxu1 }
0x22cb   :  { %v3620_v9 = vadd.f32 %v4641_v37, %v3460_v8 }
0x22cc   :  { %v3610_v46 = vpop.f32.mrf.mxu1 }
0x22cd   :  { %v4070_v10 = vmul.f32 -1.442695, %v3620_v9  ;;  %v3619_v11 = vadd.f32 %v3610_v46, %v3455_v38 }
0x22cf   :  { %4759 = vpow2.f32 %v4070_v10  ;;  %v4069_v47 = vmul.f32 -1.442695, %v3619_v11 }
0x22d1   :  { %4761 = vpow2.f32 %v4069_v47 }
0x22dc   :  { %v4760_v57 = vpop.eup %4759 }
0x22dd   :  { %v3628_v48 = vadd.f32 1.0, %v4760_v57 }
0x22de   :  { %v4762_v49 = vpop.eup %4761 }
0x22df   :  { %4763 = vrcp.f32 %v3628_v48  ;;  %v3627_v50 = vadd.f32 1.0, %v4762_v49 }
0x22e1   :  { %4765 = vrcp.f32 %v3627_v50 }
0x22ec   :  { %v4764_v51 = vpop.eup %4763 }
0x22ed   :  { %v3642_v53 = vmul.f32 %v4764_v51, %v3638_v52  ;;  %v3822_v2 = vsub.f32 1.0, %v4764_v51  ;;  %v3820_v29 = vmul.f32 %v4764_v51, %v5470_v43 }
0x22ee   :  { %v4766_v54 = vpop.eup %4765 }
0x22ef   :  { %3647 = vrot.lane.b32.xlu0 %v3642_v53, %s4791_s24  ;;  %v3641_v62 = vmul.f32 %v4766_v54, %v3636_v55  ;;  %v3821_v7 = vsub.f32 1.0, %v4766_v54  ;;  %v3819_v28 = vmul.f32 %v4766_v54, %v5473_v19 }
0x22f1   :  { %3645 = vrot.lane.b32.xlu1 %v3641_v62, %s4791_s24 }
0x2361   :  { %v3648_v58 = vpop.permute.xlu0 %3647 }
0x2362   :  { %4642 = vmatprep.subr.mxu0 %v3648_v58 }
0x2363   :  { %4643 = vmatpush3.msra.mxu0 %v3648_v58  ;;  %v3646_v26 = vpop.permute.xlu1 %3645 }
0x2364   :  { %4644 = vmatprep.subr.mxu0 %v3646_v26 }
0x2365   :  { %4645 = vmatpush3.msra.mxu0 %v3646_v26 }
0x2366   :  { %4647 = vmatmul.mubr.msk.f32.vlgmr.msra.gmra.mxu0 %vm261_vm2, %v5303_v56  ;;  %4649 = vmatprep.subr.mxu0 %v5348_v33 }
0x2367   :  { %4650 = vmatpush3.msra.mxu0 %v5348_v33 }
0x2368   :  { %4651 = vmatprep.subr.mxu0 %v5355_v34 }
0x2369   :  { %4652 = vmatpush3.msra.mxu0 %v5355_v34  ;;  %v3838_v34 = vld [vmem:[%s5546_s6 + $0x18] sm:$0xff] }
0x236a   :  { %4653 = vmatprep.subr.mxu0 %v5362_v39  ;;  %4660 = vmatprep.subr.mxu1 %v3838_v34 }
0x236b   :  { %4654 = vmatpush3.msra.mxu0 %v5362_v39  ;;  %4661 = vmatpush3.msra.mxu1 %v3838_v34 }
0x236c   :  { %4655 = vmatprep.subr.mxu0 %v5369_v20  ;;  %4662 = vmatprep.subr.mxu1 %v3837_v27 }
0x236d   :  { %4656 = vmatpush3.msra.mxu0 %v5369_v20  ;;  %4663 = vmatpush3.msra.mxu1 %v3837_v27 }
0x236e   :  { %4664 = vmatprep.subr.mxu1 %v3836_v63 }
0x236f   :  { %4665 = vmatpush3.msra.mxu1 %v3836_v63 }
0x2370   :  { %4666 = vmatprep.subr.mxu1 %v3835_v0 }
0x2371   :  { %4667 = vmatpush3.msra.mxu1 %v3835_v0 }
0x2426   :  { %v4648_v59 = vpop.f32.mrf.mxu0 }
0x2428   :  { %v3717_v60 = vpop.f32.mrf.mxu0 }
0x2429   :  { %4657 = vmatprep.mubr.msk.f32.mxu0 %vm418_vm3, %v3717_v60 }
0x242a   :  { %4658 = vmatmul.mubr.msk.f32.vlgmr.msra.gmra.mxu0 %vm418_vm3, %v4648_v59 }
0x24ea   :  { %v4659_v56 = vpop.f32.mrf.mxu0 }
0x24eb   :  { %3811 = vrot.lane.b32.xlu1 %v4659_v56, %s4792_s11 }
0x24ec   :  { %v3798_v33 = vpop.f32.mrf.mxu0 }
0x24ed   :  { %3809 = vrot.lane.b32.xlu0 %v3798_v33, %s4792_s11 }
0x255d   :  { %v3812_v39 = vpop.permute.xlu1 %3811 }
0x255e   :  { %v3816_v20 = vadd.f32 %v3812_v39, %v3460_v8 }
0x255f   :  { %v3810_v61 = vpop.permute.xlu0 %3809 }
0x2560   :  { %4767 = vtanh.f32 %v3816_v20  ;;  %v3815_v24 = vadd.f32 %v3810_v61, %v3455_v38 }
0x2562   :  { %4769 = vtanh.f32 %v3815_v24 }
0x256d   :  { %v4768_v25 = vpop.eup %4767 }
0x256e   :  { %3827 = vrot.lane.b32.xlu1 %v4768_v25, %s4792_s11 }
0x256f   :  { %v4770_v1 = vpop.eup %4769 }
0x2570   :  { %3825 = vrot.lane.b32.xlu0 %v4770_v1, %s4792_s11 }
0x25e0   :  { %v3828_v4 = vpop.permute.xlu1 %3827 }
0x25e1   :  { %v3832_v12 = vmul.f32 %v3828_v4, %v3822_v2 }
0x25e2   :  { %v3826_v13 = vpop.permute.xlu0 %3825 }
0x25e3   :  { %v3831_v15 = vmul.f32 %v3826_v13, %v3821_v7  ;;  %v3834_v17 = vadd.f32 %v3832_v12, %v3820_v29 }
0x25e5   :  { %v3833_v5 = vadd.f32 %v3831_v15, %v3819_v28 }
0x25e7   :  { %4668 = vmatprep.mubr.msk.f32.mxu1 %vm418_vm3, %v3833_v5 }
0x25e8   :  { %4669 = vmatmul.mubr.msk.f32.vlgmr.msra.gmra.mxu1 %vm418_vm3, %v3834_v17 }
0x26a8   :  { %v4670_v14 = vpop.f32.mrf.mxu1 }
0x26a9   :  { %v3924_v31 = vadd.f32 %v4670_v14, %v4075_v30 }
0x26aa   :  { %v3918_v32 = vpop.f32.mrf.mxu1 }
0x26ab   :  { %v3928_v22 = vmax.f32 %v3924_v31, 0.0  ;;  %v3919_v23 = vadd.f32 %v4075_v30, %v3918_v32 }
0x26ad   :  { %v3927_v40 = vmax.f32 %v3919_v23, 0.0  ;;  %v3932_v18 = vsel %vm63_vm1, %v3928_v22, -inf }
0x26ae   :  { %3933 = vmax.xlane.f32.xlu1 %v3932_v18 }
0x26af   :  { %v3929_v41 = vsel %vm63_vm1, %v3927_v40, -inf }
0x26b0   :  { %3930 = vmax.xlane.f32.xlu0 %v3929_v41 }
0x2737   :  { %v3934_v3 = vpop.xlane.xlu1 %3933 }
0x2738   :  { %v3936_v42 = vsub.f32 %v3928_v22, %v3934_v3 }
0x2739   :  { %v3931_v21 = vpop.xlane.xlu0 %3930 }
0x273a   :  { %v3935_v43 = vsub.f32 %v3927_v40, %v3931_v21  ;;  %v3939_v16 = vmul.f32 1.442695, %v3936_v42 }
0x273c   :  { %v3937_v44 = vmul.f32 1.442695, %v3935_v43 }
0x273e   :  { %4771 = vpow2.f32 %v3937_v44 }
0x273f   :  { %4773 = vpow2.f32 %v3939_v16 }
0x274b   :  { %v4772_v19 = vpop.eup %4771 }
0x274c   :  { %v3941_v45 = vsel %vm63_vm1, %v4772_v19, 0.0  ;;  %v4774_v6 = vpop.eup %4773 }
0x274d   :  { %3942 = vadd.xlane.f32.xlu0 %v3941_v45  ;;  %v3944_v35 = vsel %vm63_vm1, %v4774_v6, 0.0 }
0x2751   :  { %3945 = vadd.xlane.f32.xlu0 %v3944_v35 }
0x27d6   :  { %v3943_v36 = vpop.xlane.xlu0 %3942 }
0x27d7   :  { %4775 = vlog2.f32 %v3943_v36 }
0x27da   :  { %v3946_v8 = vpop.xlane.xlu0 %3945 }
0x27db   :  { %4777 = vlog2.f32 %v3946_v8 }
0x27e4   :  { %v4776_v37 = vpop.eup %4775 }
0x27e5   :  { %v3948_v38 = vmul.f32 0.6931472, %v4776_v37 }
0x27e7   :  { %v3951_v9 = vadd.f32 %v3948_v38, %v3931_v21 }
0x27e8   :  { %v4778_v46 = vpop.eup %4777 }
0x27e9   :  { %v3953_v10 = vsub.f32 %v3927_v40, %v3951_v9  ;;  %v3950_v11 = vmul.f32 0.6931472, %v4778_v46 }
0x27eb   :  { %3955 = vst.msk [vmem:[%s5548_s8] sm:$0xff] %vm63_vm1, %v3953_v10  ;;  %v3952_v47 = vadd.f32 %v3950_v11, %v3934_v3 }
0x27ed   :  { %v3954_v57 = vsub.f32 %v3928_v22, %v3952_v47 }
0x27ef   :  { %3956 = vst.msk [vmem:[%s5548_s8 + $0x8] sm:$0xff] %vm63_vm1, %v3954_v57 }

</bundles_post_ra>
